<compile_context>
chip_gen: v6e
topology: v6e:2x2x1
jax: 0.10.0
libtpu: 0.0.40
codegen_flags: <defaults>
</compile_context>

<pallas_src>
import functools

import jax
import jax.numpy as jnp
from jax import lax
from jax.experimental import pallas as pl
from jax.experimental.pallas import tpu as pltpu


def make_positional_encoding(dim, max_len=5000):
    """Mirrors *this module's* PositionalEncoding buffer construction.

    Note: the given OpenNMT module uses a div_term that spans ALL columns
    (pe[p, j] = p * 10000**(-2j/dim), sin on even j, cos on odd j), i.e. it does
    NOT share one frequency per (sin, cos) pair like the "standard" transformer
    PE.  We reproduce the module exactly.
    Returns (max_len, dim) float32.
    """
    positions = jnp.arange(0, max_len, dtype=jnp.float32)[:, None]        # (max_len, 1)
    div_term = 1.0 / jnp.power(
        10000.0, jnp.arange(0, dim * 2, 2, dtype=jnp.float32) / dim)      # (dim,)
    pe = positions * div_term                                             # (max_len, dim)
    pe = pe.at[:, 0::2].set(jnp.sin(pe[:, 0::2]))
    pe = pe.at[:, 1::2].set(jnp.cos(pe[:, 1::2]))
    return pe


def prepare_embedding_params(weight, pe_table):
    """One-time (init-time) padding of the table & PE to a lane-dense dim.

    Hoisted out of the jitted forward so a non-128-multiple dim does not cost an
    O(V*D_pad) HBM copy on every call.  No-op when dim % 128 == 0.
    """
    _, D = weight.shape
    D_pad = ((D + 127) // 128) * 128
    if D_pad != D:
        weight = jnp.pad(weight, ((0, 0), (0, D_pad - D)))
        pe_table = jnp.pad(pe_table, ((0, 0), (0, D_pad - D)))
    return weight, pe_table


def _choose_tile_len(L, D_pad, vmem_budget_bytes=12 * 1024 * 1024):
    # Working set per grid step: double-buffered output block + double-buffered
    # PE block, both (tile_len, D_pad) f32  ->  16 * D_pad bytes per row.
    rows = vmem_budget_bytes // (16 * D_pad)
    rows = max(8, min(rows, 512))   # cap per-tile DMA count; amortize ~0.35us/step
    rows = 8 * (rows // 8)
    return int(rows)


def _make_embed_kernel(*, valid_len, tile_len, l_pad, chunk_rows, n_chunks):
    """Build the kernel with all shape/static parameters closed over.

    Kernel args (PrefetchScalarGridSpec, num_scalar_prefetch=1):
      ids_ref:   (B*L_pad,) int32 SMEM  -- flat token ids, batch-major
      pe_ref:    (tile_len, D_pad) f32 VMEM  -- PE rows of this position tile
      table_ref: (V, D_pad) f32 HBM (memory_space=pl.ANY)
      out_ref:   (tile_len, D_pad) f32 VMEM output block (also DMA landing buf)
      sems:      (n_chunks,) DMA semaphores
    """
    needs_guard = (valid_len != l_pad)   # only the tail tile can hold pad rows

    def kernel(ids_ref, pe_ref, table_ref, out_ref, sems):
        i = pl.program_id(0)             # position-tile index
        b = pl.program_id(1)             # batch index
        pos0 = i * tile_len              # first position of this tile
        id_base = b * l_pad + pos0       # flat id index of this tile's row 0

        # ---- Phase 1: issue ALL row gathers of the tile (HBM table row ->
        #      this tile's VMEM output block); chunk c signals sems[c].  All
        #      scalar id reads happen before any DMA wait. ----
        for c in range(n_chunks):
            r0 = c * chunk_rows
            rows = min(chunk_rows, tile_len - r0)

            def issue_one(r, carry, r0=r0, c=c):
                rr = r0 + r

                def do():
                    tok = ids_ref[id_base + rr]
                    pltpu.make_async_copy(
                        table_ref.at[pl.ds(tok, 1)],   # (1, D_pad) HBM row
                        out_ref.at[pl.ds(rr, 1)],      # lands straight in the out block
                        sems.at[c],
                    ).start()

                if needs_guard:
                    pl.when(pos0 + rr < valid_len)(do)   # skip pad positions
                else:
                    do()
                return carry

            lax.fori_loop(0, rows, issue_one, None, unroll=min(8, rows))

        # ---- Phase 2: per chunk, wait for its gathers then do its PE add
        #      immediately (full-sublane, lane-dense loads/stores) while later
        #      chunks' gathers are still in flight. ----
        for c in range(n_chunks):
            r0 = c * chunk_rows
            rows = min(chunk_rows, tile_len - r0)

            def wait_one(r, carry, r0=r0, c=c):
                rr = r0 + r

                def do():
                    pltpu.make_async_copy(
                        table_ref.at[pl.ds(0, 1)],     # dummy src: shape/sem only
                        out_ref.at[pl.ds(rr, 1)],
                        sems.at[c],
                    ).wait()

                if needs_guard:
                    pl.when(pos0 + rr < valid_len)(do)
                else:
                    do()
                return carry

            lax.fori_loop(0, rows, wait_one, None, unroll=min(8, rows))

            sl = pl.ds(r0, rows)                       # r0, rows are multiples of 8
            out_ref[sl, :] = out_ref[sl, :] + pe_ref[sl, :]
        # TODO(synk): dropout (module default p=0 / eval) is identity; omitted.

    return kernel


@functools.partial(jax.jit, static_argnames=("dim", "tile_len"))
def embeddings_forward(input_idx, weight_p, pe_p, *, dim, tile_len=None):
    """
    input_idx: (len, batch) int32 token indices
    weight_p:  (vocab, D_pad) f32 embedding table, D padded to a multiple of 128
               (padding_idx row already zeroed; use prepare_embedding_params)
    pe_p:      (max_len, D_pad) f32 positional-encoding buffer (same padding)
    dim:       true embedding size (static)
    returns:   (len, batch, dim) f32
    """
    L, B = input_idx.shape
    _, D_pad = weight_p.shape

    if tile_len is None:
        tile_len = _choose_tile_len(L, D_pad)
    tile_len = max(8, 8 * (int(tile_len) // 8))
    tile_len = min(tile_len, 8 * ((L + 7) // 8))

    n_pos = (L + tile_len - 1) // tile_len
    L_pad = n_pos * tile_len
    if L_pad > pe_p.shape[0]:
        raise ValueError(
            f"sequence length {L} (padded {L_pad}) exceeds PE max_len {pe_p.shape[0]}")

    # <=8 wait-chunks per tile, each a multiple of 8 rows (aligned slices).
    chunk_rows = 8 * ((tile_len + 63) // 64)
    n_chunks = (tile_len + chunk_rows - 1) // chunk_rows

    # Flat ids, batch-major / position-inner: ids_flat[b*L_pad + p] = input[p, b].
    # NOTE: scalar-prefetched whole; for very long L*B, switch to per-tile id DMA.
    ids = jnp.pad(input_idx.astype(jnp.int32), ((0, L_pad - L), (0, 0)))
    ids_flat = ids.T.reshape(B * L_pad)

    pe_in = pe_p[:L_pad]

    kernel = _make_embed_kernel(valid_len=L, tile_len=tile_len, l_pad=L_pad,
                                chunk_rows=chunk_rows, n_chunks=n_chunks)

    out_flat = pl.pallas_call(
        kernel,
        out_shape=jax.ShapeDtypeStruct((B * L_pad, D_pad), jnp.float32),
        grid_spec=pltpu.PrefetchScalarGridSpec(
            num_scalar_prefetch=1,
            grid=(n_pos, B),          # b innermost -> the PE block is revisited
            in_specs=[
                pl.BlockSpec((tile_len, D_pad), lambda i, b, ids_sm: (i, 0)),  # PE
                pl.BlockSpec(memory_space=pl.ANY),                             # table (HBM)
            ],
            out_specs=pl.BlockSpec(
                (tile_len, D_pad),
                lambda i, b, ids_sm: (b * n_pos + i, 0)),
            scratch_shapes=[pltpu.SemaphoreType.DMA((n_chunks,))],
        ),
        compiler_params=pltpu.CompilerParams(
            # Both axes are independent; "parallel" lets multi-TC parts split them.
            dimension_semantics=("parallel", "parallel"),
            vmem_limit_bytes=32 * 1024 * 1024,
        ),
    )(ids_flat, pe_in, weight_p)

    # (B*L_pad, D_pad) batch-major rows -> (len, batch, dim); layout plumbing only.
    out = out_flat.reshape(B, L_pad, D_pad).transpose(1, 0, 2)
    return out[:L, :, :dim]


if __name__ == "__main__":
    # Small, module-consistent shapes.  seq=24 with tile_len=16 exercises the
    # multi-tile grid, chunked waits, and the padded tail-tile guard.
    seq_len, batch = 24, 2
    vocab_size, word_vec_size = 100, 32
    word_padding_idx = 1

    key = jax.random.PRNGKey(0)
    k_w, k_i = jax.random.split(key)

    # nn.Embedding init: N(0, 1); padding_idx row is zeroed.
    weight = jax.random.normal(k_w, (vocab_size, word_vec_size), dtype=jnp.float32)
    weight = weight.at[word_padding_idx].set(0.0)

    # Input: LongTensor [len x batch] of token indices (include some padding tokens).
    input_idx = jax.random.randint(k_i, (seq_len, batch), 0, vocab_size, dtype=jnp.int32)
    input_idx = input_idx.at[-1, :].set(word_padding_idx)

    pe_table = make_positional_encoding(word_vec_size, max_len=5000)

    # One-time, out-of-jit lane-dense padding of the parameters.
    weight_p, pe_p = prepare_embedding_params(weight, pe_table)

    out = embeddings_forward(input_idx, weight_p, pe_p, dim=word_vec_size, tile_len=16)
    out = jax.block_until_ready(out)

    # Pure-JAX reference: emb = weight[idx]; emb = emb + pe[:len, None, :].
    ref = weight[input_idx] + pe_table[:seq_len][:, None, :]
    assert out.shape == (seq_len, batch, word_vec_size)
    assert jnp.allclose(out, ref, atol=1e-5, rtol=1e-5)

    print("KERNEL_OK")
</pallas_src>

<mosaic_0001>
module attributes {stable_mosaic.version = 11 : i64} {
  func.func @kernel(%arg0: i32, %arg1: i32, %arg2: memref<64xi32, #tpu.memory_space<smem>>, %arg3: memref<16x128xf32, #tpu.memory_space<vmem>>, %arg4: memref<100x128xf32, #tpu.memory_space<any>>, %arg5: memref<16x128xf32, #tpu.memory_space<vmem>>, %arg6: memref<2x!tpu.dma_semaphore, #tpu.memory_space<semaphore_mem>>) attributes {dimension_semantics = [#tpu.dimension_semantics<parallel>, #tpu.dimension_semantics<parallel>], iteration_bounds = array<i64: 2, 2>, scalar_prefetch = 1 : i64, scratch_operands = 1 : i64, tpu.core_type = #tpu.core_type<tc>, window_params = [{transform_indices = @transform_0, window_bounds = array<i64: 16, 128>}, {}, {transform_indices = @transform_2, window_bounds = array<i64: 16, 128>}]} {
    %c16_i32 = arith.constant 16 : i32
    %0 = arith.muli %arg0, %c16_i32 : i32
    %c32_i32 = arith.constant 32 : i32
    %1 = arith.muli %arg1, %c32_i32 : i32
    %2 = arith.addi %1, %0 : i32
    %c0_i32 = arith.constant 0 : i32
    %c0_i32_0 = arith.constant 0 : i32
    %3 = arith.addi %c0_i32_0, %c0_i32 : i32
    %4 = arith.addi %0, %3 : i32
    %c24_i32 = arith.constant 24 : i32
    %5 = arith.cmpi slt, %4, %c24_i32 : i32
    %6 = arith.extui %5 : i1 to i32
    %c0_i32_1 = arith.constant 0 : i32
    %7 = arith.cmpi ne, %6, %c0_i32_1 : i32
    scf.if %7 {
      %171 = arith.addi %2, %3 : i32
      %172 = arith.index_cast %171 : i32 to index
      %173 = memref.load %arg2[%172] : memref<64xi32, #tpu.memory_space<smem>>
      %c0_i32_132 = arith.constant 0 : i32
      %c0_i32_133 = arith.constant 0 : i32
      %174 = tpu.memref_slice %arg4[%173, %c0_i32_133] : memref<100x128xf32, #tpu.memory_space<any>> -> memref<1x128xf32, #tpu.memory_space<any>>
      %c0_i32_134 = arith.constant 0 : i32
      %175 = tpu.memref_slice %arg5[%3, %c0_i32_134] : memref<16x128xf32, #tpu.memory_space<vmem>> -> memref<1x128xf32, #tpu.memory_space<vmem>>
      %176 = tpu.memref_slice %arg6[%c0_i32_132] : memref<2x!tpu.dma_semaphore, #tpu.memory_space<semaphore_mem>> -> memref<1x!tpu.dma_semaphore, #tpu.memory_space<semaphore_mem>>
      %177 = tpu.memref_squeeze %176 : memref<1x!tpu.dma_semaphore, #tpu.memory_space<semaphore_mem>> -> memref<!tpu.dma_semaphore, #tpu.memory_space<semaphore_mem>>
      tpu.enqueue_dma source(%174 : memref<1x128xf32, #tpu.memory_space<any>>) target(%175 : memref<1x128xf32, #tpu.memory_space<vmem>>) target_semaphore(%177 : memref<!tpu.dma_semaphore, #tpu.memory_space<semaphore_mem>>)
    } else {
    }
    %c1_i32 = arith.constant 1 : i32
    %c0_i32_2 = arith.constant 0 : i32
    %8 = arith.addi %c0_i32_2, %c1_i32 : i32
    %9 = arith.addi %0, %8 : i32
    %c24_i32_3 = arith.constant 24 : i32
    %10 = arith.cmpi slt, %9, %c24_i32_3 : i32
    %11 = arith.extui %10 : i1 to i32
    %c0_i32_4 = arith.constant 0 : i32
    %12 = arith.cmpi ne, %11, %c0_i32_4 : i32
    scf.if %12 {
      %171 = arith.addi %2, %8 : i32
      %172 = arith.index_cast %171 : i32 to index
      %173 = memref.load %arg2[%172] : memref<64xi32, #tpu.memory_space<smem>>
      %c0_i32_132 = arith.constant 0 : i32
      %c0_i32_133 = arith.constant 0 : i32
      %174 = tpu.memref_slice %arg4[%173, %c0_i32_133] : memref<100x128xf32, #tpu.memory_space<any>> -> memref<1x128xf32, #tpu.memory_space<any>>
      %c0_i32_134 = arith.constant 0 : i32
      %175 = tpu.memref_slice %arg5[%8, %c0_i32_134] : memref<16x128xf32, #tpu.memory_space<vmem>> -> memref<1x128xf32, #tpu.memory_space<vmem>>
      %176 = tpu.memref_slice %arg6[%c0_i32_132] : memref<2x!tpu.dma_semaphore, #tpu.memory_space<semaphore_mem>> -> memref<1x!tpu.dma_semaphore, #tpu.memory_space<semaphore_mem>>
      %177 = tpu.memref_squeeze %176 : memref<1x!tpu.dma_semaphore, #tpu.memory_space<semaphore_mem>> -> memref<!tpu.dma_semaphore, #tpu.memory_space<semaphore_mem>>
      tpu.enqueue_dma source(%174 : memref<1x128xf32, #tpu.memory_space<any>>) target(%175 : memref<1x128xf32, #tpu.memory_space<vmem>>) target_semaphore(%177 : memref<!tpu.dma_semaphore, #tpu.memory_space<semaphore_mem>>)
    } else {
    }
    %c2_i32 = arith.constant 2 : i32
    %c0_i32_5 = arith.constant 0 : i32
    %13 = arith.addi %c0_i32_5, %c2_i32 : i32
    %14 = arith.addi %0, %13 : i32
    %c24_i32_6 = arith.constant 24 : i32
    %15 = arith.cmpi slt, %14, %c24_i32_6 : i32
    %16 = arith.extui %15 : i1 to i32
    %c0_i32_7 = arith.constant 0 : i32
    %17 = arith.cmpi ne, %16, %c0_i32_7 : i32
    scf.if %17 {
      %171 = arith.addi %2, %13 : i32
      %172 = arith.index_cast %171 : i32 to index
      %173 = memref.load %arg2[%172] : memref<64xi32, #tpu.memory_space<smem>>
      %c0_i32_132 = arith.constant 0 : i32
      %c0_i32_133 = arith.constant 0 : i32
      %174 = tpu.memref_slice %arg4[%173, %c0_i32_133] : memref<100x128xf32, #tpu.memory_space<any>> -> memref<1x128xf32, #tpu.memory_space<any>>
      %c0_i32_134 = arith.constant 0 : i32
      %175 = tpu.memref_slice %arg5[%13, %c0_i32_134] : memref<16x128xf32, #tpu.memory_space<vmem>> -> memref<1x128xf32, #tpu.memory_space<vmem>>
      %176 = tpu.memref_slice %arg6[%c0_i32_132] : memref<2x!tpu.dma_semaphore, #tpu.memory_space<semaphore_mem>> -> memref<1x!tpu.dma_semaphore, #tpu.memory_space<semaphore_mem>>
      %177 = tpu.memref_squeeze %176 : memref<1x!tpu.dma_semaphore, #tpu.memory_space<semaphore_mem>> -> memref<!tpu.dma_semaphore, #tpu.memory_space<semaphore_mem>>
      tpu.enqueue_dma source(%174 : memref<1x128xf32, #tpu.memory_space<any>>) target(%175 : memref<1x128xf32, #tpu.memory_space<vmem>>) target_semaphore(%177 : memref<!tpu.dma_semaphore, #tpu.memory_space<semaphore_mem>>)
    } else {
    }
    %c3_i32 = arith.constant 3 : i32
    %c0_i32_8 = arith.constant 0 : i32
    %18 = arith.addi %c0_i32_8, %c3_i32 : i32
    %19 = arith.addi %0, %18 : i32
    %c24_i32_9 = arith.constant 24 : i32
    %20 = arith.cmpi slt, %19, %c24_i32_9 : i32
    %21 = arith.extui %20 : i1 to i32
    %c0_i32_10 = arith.constant 0 : i32
    %22 = arith.cmpi ne, %21, %c0_i32_10 : i32
    scf.if %22 {
      %171 = arith.addi %2, %18 : i32
      %172 = arith.index_cast %171 : i32 to index
      %173 = memref.load %arg2[%172] : memref<64xi32, #tpu.memory_space<smem>>
      %c0_i32_132 = arith.constant 0 : i32
      %c0_i32_133 = arith.constant 0 : i32
      %174 = tpu.memref_slice %arg4[%173, %c0_i32_133] : memref<100x128xf32, #tpu.memory_space<any>> -> memref<1x128xf32, #tpu.memory_space<any>>
      %c0_i32_134 = arith.constant 0 : i32
      %175 = tpu.memref_slice %arg5[%18, %c0_i32_134] : memref<16x128xf32, #tpu.memory_space<vmem>> -> memref<1x128xf32, #tpu.memory_space<vmem>>
      %176 = tpu.memref_slice %arg6[%c0_i32_132] : memref<2x!tpu.dma_semaphore, #tpu.memory_space<semaphore_mem>> -> memref<1x!tpu.dma_semaphore, #tpu.memory_space<semaphore_mem>>
      %177 = tpu.memref_squeeze %176 : memref<1x!tpu.dma_semaphore, #tpu.memory_space<semaphore_mem>> -> memref<!tpu.dma_semaphore, #tpu.memory_space<semaphore_mem>>
      tpu.enqueue_dma source(%174 : memref<1x128xf32, #tpu.memory_space<any>>) target(%175 : memref<1x128xf32, #tpu.memory_space<vmem>>) target_semaphore(%177 : memref<!tpu.dma_semaphore, #tpu.memory_space<semaphore_mem>>)
    } else {
    }
    %c4_i32 = arith.constant 4 : i32
    %c0_i32_11 = arith.constant 0 : i32
    %23 = arith.addi %c0_i32_11, %c4_i32 : i32
    %24 = arith.addi %0, %23 : i32
    %c24_i32_12 = arith.constant 24 : i32
    %25 = arith.cmpi slt, %24, %c24_i32_12 : i32
    %26 = arith.extui %25 : i1 to i32
    %c0_i32_13 = arith.constant 0 : i32
    %27 = arith.cmpi ne, %26, %c0_i32_13 : i32
    scf.if %27 {
      %171 = arith.addi %2, %23 : i32
      %172 = arith.index_cast %171 : i32 to index
      %173 = memref.load %arg2[%172] : memref<64xi32, #tpu.memory_space<smem>>
      %c0_i32_132 = arith.constant 0 : i32
      %c0_i32_133 = arith.constant 0 : i32
      %174 = tpu.memref_slice %arg4[%173, %c0_i32_133] : memref<100x128xf32, #tpu.memory_space<any>> -> memref<1x128xf32, #tpu.memory_space<any>>
      %c0_i32_134 = arith.constant 0 : i32
      %175 = tpu.memref_slice %arg5[%23, %c0_i32_134] : memref<16x128xf32, #tpu.memory_space<vmem>> -> memref<1x128xf32, #tpu.memory_space<vmem>>
      %176 = tpu.memref_slice %arg6[%c0_i32_132] : memref<2x!tpu.dma_semaphore, #tpu.memory_space<semaphore_mem>> -> memref<1x!tpu.dma_semaphore, #tpu.memory_space<semaphore_mem>>
      %177 = tpu.memref_squeeze %176 : memref<1x!tpu.dma_semaphore, #tpu.memory_space<semaphore_mem>> -> memref<!tpu.dma_semaphore, #tpu.memory_space<semaphore_mem>>
      tpu.enqueue_dma source(%174 : memref<1x128xf32, #tpu.memory_space<any>>) target(%175 : memref<1x128xf32, #tpu.memory_space<vmem>>) target_semaphore(%177 : memref<!tpu.dma_semaphore, #tpu.memory_space<semaphore_mem>>)
    } else {
    }
    %c5_i32 = arith.constant 5 : i32
    %c0_i32_14 = arith.constant 0 : i32
    %28 = arith.addi %c0_i32_14, %c5_i32 : i32
    %29 = arith.addi %0, %28 : i32
    %c24_i32_15 = arith.constant 24 : i32
    %30 = arith.cmpi slt, %29, %c24_i32_15 : i32
    %31 = arith.extui %30 : i1 to i32
    %c0_i32_16 = arith.constant 0 : i32
    %32 = arith.cmpi ne, %31, %c0_i32_16 : i32
    scf.if %32 {
      %171 = arith.addi %2, %28 : i32
      %172 = arith.index_cast %171 : i32 to index
      %173 = memref.load %arg2[%172] : memref<64xi32, #tpu.memory_space<smem>>
      %c0_i32_132 = arith.constant 0 : i32
      %c0_i32_133 = arith.constant 0 : i32
      %174 = tpu.memref_slice %arg4[%173, %c0_i32_133] : memref<100x128xf32, #tpu.memory_space<any>> -> memref<1x128xf32, #tpu.memory_space<any>>
      %c0_i32_134 = arith.constant 0 : i32
      %175 = tpu.memref_slice %arg5[%28, %c0_i32_134] : memref<16x128xf32, #tpu.memory_space<vmem>> -> memref<1x128xf32, #tpu.memory_space<vmem>>
      %176 = tpu.memref_slice %arg6[%c0_i32_132] : memref<2x!tpu.dma_semaphore, #tpu.memory_space<semaphore_mem>> -> memref<1x!tpu.dma_semaphore, #tpu.memory_space<semaphore_mem>>
      %177 = tpu.memref_squeeze %176 : memref<1x!tpu.dma_semaphore, #tpu.memory_space<semaphore_mem>> -> memref<!tpu.dma_semaphore, #tpu.memory_space<semaphore_mem>>
      tpu.enqueue_dma source(%174 : memref<1x128xf32, #tpu.memory_space<any>>) target(%175 : memref<1x128xf32, #tpu.memory_space<vmem>>) target_semaphore(%177 : memref<!tpu.dma_semaphore, #tpu.memory_space<semaphore_mem>>)
    } else {
    }
    %c6_i32 = arith.constant 6 : i32
    %c0_i32_17 = arith.constant 0 : i32
    %33 = arith.addi %c0_i32_17, %c6_i32 : i32
    %34 = arith.addi %0, %33 : i32
    %c24_i32_18 = arith.constant 24 : i32
    %35 = arith.cmpi slt, %34, %c24_i32_18 : i32
    %36 = arith.extui %35 : i1 to i32
    %c0_i32_19 = arith.constant 0 : i32
    %37 = arith.cmpi ne, %36, %c0_i32_19 : i32
    scf.if %37 {
      %171 = arith.addi %2, %33 : i32
      %172 = arith.index_cast %171 : i32 to index
      %173 = memref.load %arg2[%172] : memref<64xi32, #tpu.memory_space<smem>>
      %c0_i32_132 = arith.constant 0 : i32
      %c0_i32_133 = arith.constant 0 : i32
      %174 = tpu.memref_slice %arg4[%173, %c0_i32_133] : memref<100x128xf32, #tpu.memory_space<any>> -> memref<1x128xf32, #tpu.memory_space<any>>
      %c0_i32_134 = arith.constant 0 : i32
      %175 = tpu.memref_slice %arg5[%33, %c0_i32_134] : memref<16x128xf32, #tpu.memory_space<vmem>> -> memref<1x128xf32, #tpu.memory_space<vmem>>
      %176 = tpu.memref_slice %arg6[%c0_i32_132] : memref<2x!tpu.dma_semaphore, #tpu.memory_space<semaphore_mem>> -> memref<1x!tpu.dma_semaphore, #tpu.memory_space<semaphore_mem>>
      %177 = tpu.memref_squeeze %176 : memref<1x!tpu.dma_semaphore, #tpu.memory_space<semaphore_mem>> -> memref<!tpu.dma_semaphore, #tpu.memory_space<semaphore_mem>>
      tpu.enqueue_dma source(%174 : memref<1x128xf32, #tpu.memory_space<any>>) target(%175 : memref<1x128xf32, #tpu.memory_space<vmem>>) target_semaphore(%177 : memref<!tpu.dma_semaphore, #tpu.memory_space<semaphore_mem>>)
    } else {
    }
    %c7_i32 = arith.constant 7 : i32
    %c0_i32_20 = arith.constant 0 : i32
    %38 = arith.addi %c0_i32_20, %c7_i32 : i32
    %39 = arith.addi %0, %38 : i32
    %c24_i32_21 = arith.constant 24 : i32
    %40 = arith.cmpi slt, %39, %c24_i32_21 : i32
    %41 = arith.extui %40 : i1 to i32
    %c0_i32_22 = arith.constant 0 : i32
    %42 = arith.cmpi ne, %41, %c0_i32_22 : i32
    scf.if %42 {
      %171 = arith.addi %2, %38 : i32
      %172 = arith.index_cast %171 : i32 to index
      %173 = memref.load %arg2[%172] : memref<64xi32, #tpu.memory_space<smem>>
      %c0_i32_132 = arith.constant 0 : i32
      %c0_i32_133 = arith.constant 0 : i32
      %174 = tpu.memref_slice %arg4[%173, %c0_i32_133] : memref<100x128xf32, #tpu.memory_space<any>> -> memref<1x128xf32, #tpu.memory_space<any>>
      %c0_i32_134 = arith.constant 0 : i32
      %175 = tpu.memref_slice %arg5[%38, %c0_i32_134] : memref<16x128xf32, #tpu.memory_space<vmem>> -> memref<1x128xf32, #tpu.memory_space<vmem>>
      %176 = tpu.memref_slice %arg6[%c0_i32_132] : memref<2x!tpu.dma_semaphore, #tpu.memory_space<semaphore_mem>> -> memref<1x!tpu.dma_semaphore, #tpu.memory_space<semaphore_mem>>
      %177 = tpu.memref_squeeze %176 : memref<1x!tpu.dma_semaphore, #tpu.memory_space<semaphore_mem>> -> memref<!tpu.dma_semaphore, #tpu.memory_space<semaphore_mem>>
      tpu.enqueue_dma source(%174 : memref<1x128xf32, #tpu.memory_space<any>>) target(%175 : memref<1x128xf32, #tpu.memory_space<vmem>>) target_semaphore(%177 : memref<!tpu.dma_semaphore, #tpu.memory_space<semaphore_mem>>)
    } else {
    }
    %c8_i32 = arith.constant 8 : i32
    %c0_i32_23 = arith.constant 0 : i32
    %c8_i32_24 = arith.constant 8 : i32
    %43 = arith.addi %c8_i32_24, %c0_i32_23 : i32
    %44 = arith.addi %0, %43 : i32
    %c24_i32_25 = arith.constant 24 : i32
    %45 = arith.cmpi slt, %44, %c24_i32_25 : i32
    %46 = arith.extui %45 : i1 to i32
    %c0_i32_26 = arith.constant 0 : i32
    %47 = arith.cmpi ne, %46, %c0_i32_26 : i32
    scf.if %47 {
      %171 = arith.addi %2, %43 : i32
      %172 = arith.index_cast %171 : i32 to index
      %173 = memref.load %arg2[%172] : memref<64xi32, #tpu.memory_space<smem>>
      %c1_i32_132 = arith.constant 1 : i32
      %c0_i32_133 = arith.constant 0 : i32
      %174 = tpu.memref_slice %arg4[%173, %c0_i32_133] : memref<100x128xf32, #tpu.memory_space<any>> -> memref<1x128xf32, #tpu.memory_space<any>>
      %c0_i32_134 = arith.constant 0 : i32
      %175 = tpu.memref_slice %arg5[%43, %c0_i32_134] : memref<16x128xf32, #tpu.memory_space<vmem>> -> memref<1x128xf32, #tpu.memory_space<vmem>>
      %176 = tpu.memref_slice %arg6[%c1_i32_132] : memref<2x!tpu.dma_semaphore, #tpu.memory_space<semaphore_mem>> -> memref<1x!tpu.dma_semaphore, #tpu.memory_space<semaphore_mem>>
      %177 = tpu.memref_squeeze %176 : memref<1x!tpu.dma_semaphore, #tpu.memory_space<semaphore_mem>> -> memref<!tpu.dma_semaphore, #tpu.memory_space<semaphore_mem>>
      tpu.enqueue_dma source(%174 : memref<1x128xf32, #tpu.memory_space<any>>) target(%175 : memref<1x128xf32, #tpu.memory_space<vmem>>) target_semaphore(%177 : memref<!tpu.dma_semaphore, #tpu.memory_space<semaphore_mem>>)
    } else {
    }
    %c1_i32_27 = arith.constant 1 : i32
    %c8_i32_28 = arith.constant 8 : i32
    %48 = arith.addi %c8_i32_28, %c1_i32_27 : i32
    %49 = arith.addi %0, %48 : i32
    %c24_i32_29 = arith.constant 24 : i32
    %50 = arith.cmpi slt, %49, %c24_i32_29 : i32
    %51 = arith.extui %50 : i1 to i32
    %c0_i32_30 = arith.constant 0 : i32
    %52 = arith.cmpi ne, %51, %c0_i32_30 : i32
    scf.if %52 {
      %171 = arith.addi %2, %48 : i32
      %172 = arith.index_cast %171 : i32 to index
      %173 = memref.load %arg2[%172] : memref<64xi32, #tpu.memory_space<smem>>
      %c1_i32_132 = arith.constant 1 : i32
      %c0_i32_133 = arith.constant 0 : i32
      %174 = tpu.memref_slice %arg4[%173, %c0_i32_133] : memref<100x128xf32, #tpu.memory_space<any>> -> memref<1x128xf32, #tpu.memory_space<any>>
      %c0_i32_134 = arith.constant 0 : i32
      %175 = tpu.memref_slice %arg5[%48, %c0_i32_134] : memref<16x128xf32, #tpu.memory_space<vmem>> -> memref<1x128xf32, #tpu.memory_space<vmem>>
      %176 = tpu.memref_slice %arg6[%c1_i32_132] : memref<2x!tpu.dma_semaphore, #tpu.memory_space<semaphore_mem>> -> memref<1x!tpu.dma_semaphore, #tpu.memory_space<semaphore_mem>>
      %177 = tpu.memref_squeeze %176 : memref<1x!tpu.dma_semaphore, #tpu.memory_space<semaphore_mem>> -> memref<!tpu.dma_semaphore, #tpu.memory_space<semaphore_mem>>
      tpu.enqueue_dma source(%174 : memref<1x128xf32, #tpu.memory_space<any>>) target(%175 : memref<1x128xf32, #tpu.memory_space<vmem>>) target_semaphore(%177 : memref<!tpu.dma_semaphore, #tpu.memory_space<semaphore_mem>>)
    } else {
    }
    %c2_i32_31 = arith.constant 2 : i32
    %c8_i32_32 = arith.constant 8 : i32
    %53 = arith.addi %c8_i32_32, %c2_i32_31 : i32
    %54 = arith.addi %0, %53 : i32
    %c24_i32_33 = arith.constant 24 : i32
    %55 = arith.cmpi slt, %54, %c24_i32_33 : i32
    %56 = arith.extui %55 : i1 to i32
    %c0_i32_34 = arith.constant 0 : i32
    %57 = arith.cmpi ne, %56, %c0_i32_34 : i32
    scf.if %57 {
      %171 = arith.addi %2, %53 : i32
      %172 = arith.index_cast %171 : i32 to index
      %173 = memref.load %arg2[%172] : memref<64xi32, #tpu.memory_space<smem>>
      %c1_i32_132 = arith.constant 1 : i32
      %c0_i32_133 = arith.constant 0 : i32
      %174 = tpu.memref_slice %arg4[%173, %c0_i32_133] : memref<100x128xf32, #tpu.memory_space<any>> -> memref<1x128xf32, #tpu.memory_space<any>>
      %c0_i32_134 = arith.constant 0 : i32
      %175 = tpu.memref_slice %arg5[%53, %c0_i32_134] : memref<16x128xf32, #tpu.memory_space<vmem>> -> memref<1x128xf32, #tpu.memory_space<vmem>>
      %176 = tpu.memref_slice %arg6[%c1_i32_132] : memref<2x!tpu.dma_semaphore, #tpu.memory_space<semaphore_mem>> -> memref<1x!tpu.dma_semaphore, #tpu.memory_space<semaphore_mem>>
      %177 = tpu.memref_squeeze %176 : memref<1x!tpu.dma_semaphore, #tpu.memory_space<semaphore_mem>> -> memref<!tpu.dma_semaphore, #tpu.memory_space<semaphore_mem>>
      tpu.enqueue_dma source(%174 : memref<1x128xf32, #tpu.memory_space<any>>) target(%175 : memref<1x128xf32, #tpu.memory_space<vmem>>) target_semaphore(%177 : memref<!tpu.dma_semaphore, #tpu.memory_space<semaphore_mem>>)
    } else {
    }
    %c3_i32_35 = arith.constant 3 : i32
    %c8_i32_36 = arith.constant 8 : i32
    %58 = arith.addi %c8_i32_36, %c3_i32_35 : i32
    %59 = arith.addi %0, %58 : i32
    %c24_i32_37 = arith.constant 24 : i32
    %60 = arith.cmpi slt, %59, %c24_i32_37 : i32
    %61 = arith.extui %60 : i1 to i32
    %c0_i32_38 = arith.constant 0 : i32
    %62 = arith.cmpi ne, %61, %c0_i32_38 : i32
    scf.if %62 {
      %171 = arith.addi %2, %58 : i32
      %172 = arith.index_cast %171 : i32 to index
      %173 = memref.load %arg2[%172] : memref<64xi32, #tpu.memory_space<smem>>
      %c1_i32_132 = arith.constant 1 : i32
      %c0_i32_133 = arith.constant 0 : i32
      %174 = tpu.memref_slice %arg4[%173, %c0_i32_133] : memref<100x128xf32, #tpu.memory_space<any>> -> memref<1x128xf32, #tpu.memory_space<any>>
      %c0_i32_134 = arith.constant 0 : i32
      %175 = tpu.memref_slice %arg5[%58, %c0_i32_134] : memref<16x128xf32, #tpu.memory_space<vmem>> -> memref<1x128xf32, #tpu.memory_space<vmem>>
      %176 = tpu.memref_slice %arg6[%c1_i32_132] : memref<2x!tpu.dma_semaphore, #tpu.memory_space<semaphore_mem>> -> memref<1x!tpu.dma_semaphore, #tpu.memory_space<semaphore_mem>>
      %177 = tpu.memref_squeeze %176 : memref<1x!tpu.dma_semaphore, #tpu.memory_space<semaphore_mem>> -> memref<!tpu.dma_semaphore, #tpu.memory_space<semaphore_mem>>
      tpu.enqueue_dma source(%174 : memref<1x128xf32, #tpu.memory_space<any>>) target(%175 : memref<1x128xf32, #tpu.memory_space<vmem>>) target_semaphore(%177 : memref<!tpu.dma_semaphore, #tpu.memory_space<semaphore_mem>>)
    } else {
    }
    %c4_i32_39 = arith.constant 4 : i32
    %c8_i32_40 = arith.constant 8 : i32
    %63 = arith.addi %c8_i32_40, %c4_i32_39 : i32
    %64 = arith.addi %0, %63 : i32
    %c24_i32_41 = arith.constant 24 : i32
    %65 = arith.cmpi slt, %64, %c24_i32_41 : i32
    %66 = arith.extui %65 : i1 to i32
    %c0_i32_42 = arith.constant 0 : i32
    %67 = arith.cmpi ne, %66, %c0_i32_42 : i32
    scf.if %67 {
      %171 = arith.addi %2, %63 : i32
      %172 = arith.index_cast %171 : i32 to index
      %173 = memref.load %arg2[%172] : memref<64xi32, #tpu.memory_space<smem>>
      %c1_i32_132 = arith.constant 1 : i32
      %c0_i32_133 = arith.constant 0 : i32
      %174 = tpu.memref_slice %arg4[%173, %c0_i32_133] : memref<100x128xf32, #tpu.memory_space<any>> -> memref<1x128xf32, #tpu.memory_space<any>>
      %c0_i32_134 = arith.constant 0 : i32
      %175 = tpu.memref_slice %arg5[%63, %c0_i32_134] : memref<16x128xf32, #tpu.memory_space<vmem>> -> memref<1x128xf32, #tpu.memory_space<vmem>>
      %176 = tpu.memref_slice %arg6[%c1_i32_132] : memref<2x!tpu.dma_semaphore, #tpu.memory_space<semaphore_mem>> -> memref<1x!tpu.dma_semaphore, #tpu.memory_space<semaphore_mem>>
      %177 = tpu.memref_squeeze %176 : memref<1x!tpu.dma_semaphore, #tpu.memory_space<semaphore_mem>> -> memref<!tpu.dma_semaphore, #tpu.memory_space<semaphore_mem>>
      tpu.enqueue_dma source(%174 : memref<1x128xf32, #tpu.memory_space<any>>) target(%175 : memref<1x128xf32, #tpu.memory_space<vmem>>) target_semaphore(%177 : memref<!tpu.dma_semaphore, #tpu.memory_space<semaphore_mem>>)
    } else {
    }
    %c5_i32_43 = arith.constant 5 : i32
    %c8_i32_44 = arith.constant 8 : i32
    %68 = arith.addi %c8_i32_44, %c5_i32_43 : i32
    %69 = arith.addi %0, %68 : i32
    %c24_i32_45 = arith.constant 24 : i32
    %70 = arith.cmpi slt, %69, %c24_i32_45 : i32
    %71 = arith.extui %70 : i1 to i32
    %c0_i32_46 = arith.constant 0 : i32
    %72 = arith.cmpi ne, %71, %c0_i32_46 : i32
    scf.if %72 {
      %171 = arith.addi %2, %68 : i32
      %172 = arith.index_cast %171 : i32 to index
      %173 = memref.load %arg2[%172] : memref<64xi32, #tpu.memory_space<smem>>
      %c1_i32_132 = arith.constant 1 : i32
      %c0_i32_133 = arith.constant 0 : i32
      %174 = tpu.memref_slice %arg4[%173, %c0_i32_133] : memref<100x128xf32, #tpu.memory_space<any>> -> memref<1x128xf32, #tpu.memory_space<any>>
      %c0_i32_134 = arith.constant 0 : i32
      %175 = tpu.memref_slice %arg5[%68, %c0_i32_134] : memref<16x128xf32, #tpu.memory_space<vmem>> -> memref<1x128xf32, #tpu.memory_space<vmem>>
      %176 = tpu.memref_slice %arg6[%c1_i32_132] : memref<2x!tpu.dma_semaphore, #tpu.memory_space<semaphore_mem>> -> memref<1x!tpu.dma_semaphore, #tpu.memory_space<semaphore_mem>>
      %177 = tpu.memref_squeeze %176 : memref<1x!tpu.dma_semaphore, #tpu.memory_space<semaphore_mem>> -> memref<!tpu.dma_semaphore, #tpu.memory_space<semaphore_mem>>
      tpu.enqueue_dma source(%174 : memref<1x128xf32, #tpu.memory_space<any>>) target(%175 : memref<1x128xf32, #tpu.memory_space<vmem>>) target_semaphore(%177 : memref<!tpu.dma_semaphore, #tpu.memory_space<semaphore_mem>>)
    } else {
    }
    %c6_i32_47 = arith.constant 6 : i32
    %c8_i32_48 = arith.constant 8 : i32
    %73 = arith.addi %c8_i32_48, %c6_i32_47 : i32
    %74 = arith.addi %0, %73 : i32
    %c24_i32_49 = arith.constant 24 : i32
    %75 = arith.cmpi slt, %74, %c24_i32_49 : i32
    %76 = arith.extui %75 : i1 to i32
    %c0_i32_50 = arith.constant 0 : i32
    %77 = arith.cmpi ne, %76, %c0_i32_50 : i32
    scf.if %77 {
      %171 = arith.addi %2, %73 : i32
      %172 = arith.index_cast %171 : i32 to index
      %173 = memref.load %arg2[%172] : memref<64xi32, #tpu.memory_space<smem>>
      %c1_i32_132 = arith.constant 1 : i32
      %c0_i32_133 = arith.constant 0 : i32
      %174 = tpu.memref_slice %arg4[%173, %c0_i32_133] : memref<100x128xf32, #tpu.memory_space<any>> -> memref<1x128xf32, #tpu.memory_space<any>>
      %c0_i32_134 = arith.constant 0 : i32
      %175 = tpu.memref_slice %arg5[%73, %c0_i32_134] : memref<16x128xf32, #tpu.memory_space<vmem>> -> memref<1x128xf32, #tpu.memory_space<vmem>>
      %176 = tpu.memref_slice %arg6[%c1_i32_132] : memref<2x!tpu.dma_semaphore, #tpu.memory_space<semaphore_mem>> -> memref<1x!tpu.dma_semaphore, #tpu.memory_space<semaphore_mem>>
      %177 = tpu.memref_squeeze %176 : memref<1x!tpu.dma_semaphore, #tpu.memory_space<semaphore_mem>> -> memref<!tpu.dma_semaphore, #tpu.memory_space<semaphore_mem>>
      tpu.enqueue_dma source(%174 : memref<1x128xf32, #tpu.memory_space<any>>) target(%175 : memref<1x128xf32, #tpu.memory_space<vmem>>) target_semaphore(%177 : memref<!tpu.dma_semaphore, #tpu.memory_space<semaphore_mem>>)
    } else {
    }
    %c7_i32_51 = arith.constant 7 : i32
    %c8_i32_52 = arith.constant 8 : i32
    %78 = arith.addi %c8_i32_52, %c7_i32_51 : i32
    %79 = arith.addi %0, %78 : i32
    %c24_i32_53 = arith.constant 24 : i32
    %80 = arith.cmpi slt, %79, %c24_i32_53 : i32
    %81 = arith.extui %80 : i1 to i32
    %c0_i32_54 = arith.constant 0 : i32
    %82 = arith.cmpi ne, %81, %c0_i32_54 : i32
    scf.if %82 {
      %171 = arith.addi %2, %78 : i32
      %172 = arith.index_cast %171 : i32 to index
      %173 = memref.load %arg2[%172] : memref<64xi32, #tpu.memory_space<smem>>
      %c1_i32_132 = arith.constant 1 : i32
      %c0_i32_133 = arith.constant 0 : i32
      %174 = tpu.memref_slice %arg4[%173, %c0_i32_133] : memref<100x128xf32, #tpu.memory_space<any>> -> memref<1x128xf32, #tpu.memory_space<any>>
      %c0_i32_134 = arith.constant 0 : i32
      %175 = tpu.memref_slice %arg5[%78, %c0_i32_134] : memref<16x128xf32, #tpu.memory_space<vmem>> -> memref<1x128xf32, #tpu.memory_space<vmem>>
      %176 = tpu.memref_slice %arg6[%c1_i32_132] : memref<2x!tpu.dma_semaphore, #tpu.memory_space<semaphore_mem>> -> memref<1x!tpu.dma_semaphore, #tpu.memory_space<semaphore_mem>>
      %177 = tpu.memref_squeeze %176 : memref<1x!tpu.dma_semaphore, #tpu.memory_space<semaphore_mem>> -> memref<!tpu.dma_semaphore, #tpu.memory_space<semaphore_mem>>
      tpu.enqueue_dma source(%174 : memref<1x128xf32, #tpu.memory_space<any>>) target(%175 : memref<1x128xf32, #tpu.memory_space<vmem>>) target_semaphore(%177 : memref<!tpu.dma_semaphore, #tpu.memory_space<semaphore_mem>>)
    } else {
    }
    %c8_i32_55 = arith.constant 8 : i32
    %c0_i32_56 = arith.constant 0 : i32
    %c0_i32_57 = arith.constant 0 : i32
    %83 = arith.addi %c0_i32_57, %c0_i32_56 : i32
    %84 = arith.addi %0, %83 : i32
    %c24_i32_58 = arith.constant 24 : i32
    %85 = arith.cmpi slt, %84, %c24_i32_58 : i32
    %86 = arith.extui %85 : i1 to i32
    %c0_i32_59 = arith.constant 0 : i32
    %87 = arith.cmpi ne, %86, %c0_i32_59 : i32
    scf.if %87 {
      %c0_i32_132 = arith.constant 0 : i32
      %c0_i32_133 = arith.constant 0 : i32
      %c0_i32_134 = arith.constant 0 : i32
      %171 = tpu.memref_slice %arg4[%c0_i32_133, %c0_i32_134] : memref<100x128xf32, #tpu.memory_space<any>> -> memref<1x128xf32, #tpu.memory_space<any>>
      %c0_i32_135 = arith.constant 0 : i32
      %172 = tpu.memref_slice %arg5[%83, %c0_i32_135] : memref<16x128xf32, #tpu.memory_space<vmem>> -> memref<1x128xf32, #tpu.memory_space<vmem>>
      %173 = tpu.memref_slice %arg6[%c0_i32_132] : memref<2x!tpu.dma_semaphore, #tpu.memory_space<semaphore_mem>> -> memref<1x!tpu.dma_semaphore, #tpu.memory_space<semaphore_mem>>
      %174 = tpu.memref_squeeze %173 : memref<1x!tpu.dma_semaphore, #tpu.memory_space<semaphore_mem>> -> memref<!tpu.dma_semaphore, #tpu.memory_space<semaphore_mem>>
      tpu.wait_dma2 semaphore(%174 : memref<!tpu.dma_semaphore, #tpu.memory_space<semaphore_mem>>) src(%171 : memref<1x128xf32, #tpu.memory_space<any>>) dst(%172 : memref<1x128xf32, #tpu.memory_space<vmem>>)
    } else {
    }
    %c1_i32_60 = arith.constant 1 : i32
    %c0_i32_61 = arith.constant 0 : i32
    %88 = arith.addi %c0_i32_61, %c1_i32_60 : i32
    %89 = arith.addi %0, %88 : i32
    %c24_i32_62 = arith.constant 24 : i32
    %90 = arith.cmpi slt, %89, %c24_i32_62 : i32
    %91 = arith.extui %90 : i1 to i32
    %c0_i32_63 = arith.constant 0 : i32
    %92 = arith.cmpi ne, %91, %c0_i32_63 : i32
    scf.if %92 {
      %c0_i32_132 = arith.constant 0 : i32
      %c0_i32_133 = arith.constant 0 : i32
      %c0_i32_134 = arith.constant 0 : i32
      %171 = tpu.memref_slice %arg4[%c0_i32_133, %c0_i32_134] : memref<100x128xf32, #tpu.memory_space<any>> -> memref<1x128xf32, #tpu.memory_space<any>>
      %c0_i32_135 = arith.constant 0 : i32
      %172 = tpu.memref_slice %arg5[%88, %c0_i32_135] : memref<16x128xf32, #tpu.memory_space<vmem>> -> memref<1x128xf32, #tpu.memory_space<vmem>>
      %173 = tpu.memref_slice %arg6[%c0_i32_132] : memref<2x!tpu.dma_semaphore, #tpu.memory_space<semaphore_mem>> -> memref<1x!tpu.dma_semaphore, #tpu.memory_space<semaphore_mem>>
      %174 = tpu.memref_squeeze %173 : memref<1x!tpu.dma_semaphore, #tpu.memory_space<semaphore_mem>> -> memref<!tpu.dma_semaphore, #tpu.memory_space<semaphore_mem>>
      tpu.wait_dma2 semaphore(%174 : memref<!tpu.dma_semaphore, #tpu.memory_space<semaphore_mem>>) src(%171 : memref<1x128xf32, #tpu.memory_space<any>>) dst(%172 : memref<1x128xf32, #tpu.memory_space<vmem>>)
    } else {
    }
    %c2_i32_64 = arith.constant 2 : i32
    %c0_i32_65 = arith.constant 0 : i32
    %93 = arith.addi %c0_i32_65, %c2_i32_64 : i32
    %94 = arith.addi %0, %93 : i32
    %c24_i32_66 = arith.constant 24 : i32
    %95 = arith.cmpi slt, %94, %c24_i32_66 : i32
    %96 = arith.extui %95 : i1 to i32
    %c0_i32_67 = arith.constant 0 : i32
    %97 = arith.cmpi ne, %96, %c0_i32_67 : i32
    scf.if %97 {
      %c0_i32_132 = arith.constant 0 : i32
      %c0_i32_133 = arith.constant 0 : i32
      %c0_i32_134 = arith.constant 0 : i32
      %171 = tpu.memref_slice %arg4[%c0_i32_133, %c0_i32_134] : memref<100x128xf32, #tpu.memory_space<any>> -> memref<1x128xf32, #tpu.memory_space<any>>
      %c0_i32_135 = arith.constant 0 : i32
      %172 = tpu.memref_slice %arg5[%93, %c0_i32_135] : memref<16x128xf32, #tpu.memory_space<vmem>> -> memref<1x128xf32, #tpu.memory_space<vmem>>
      %173 = tpu.memref_slice %arg6[%c0_i32_132] : memref<2x!tpu.dma_semaphore, #tpu.memory_space<semaphore_mem>> -> memref<1x!tpu.dma_semaphore, #tpu.memory_space<semaphore_mem>>
      %174 = tpu.memref_squeeze %173 : memref<1x!tpu.dma_semaphore, #tpu.memory_space<semaphore_mem>> -> memref<!tpu.dma_semaphore, #tpu.memory_space<semaphore_mem>>
      tpu.wait_dma2 semaphore(%174 : memref<!tpu.dma_semaphore, #tpu.memory_space<semaphore_mem>>) src(%171 : memref<1x128xf32, #tpu.memory_space<any>>) dst(%172 : memref<1x128xf32, #tpu.memory_space<vmem>>)
    } else {
    }
    %c3_i32_68 = arith.constant 3 : i32
    %c0_i32_69 = arith.constant 0 : i32
    %98 = arith.addi %c0_i32_69, %c3_i32_68 : i32
    %99 = arith.addi %0, %98 : i32
    %c24_i32_70 = arith.constant 24 : i32
    %100 = arith.cmpi slt, %99, %c24_i32_70 : i32
    %101 = arith.extui %100 : i1 to i32
    %c0_i32_71 = arith.constant 0 : i32
    %102 = arith.cmpi ne, %101, %c0_i32_71 : i32
    scf.if %102 {
      %c0_i32_132 = arith.constant 0 : i32
      %c0_i32_133 = arith.constant 0 : i32
      %c0_i32_134 = arith.constant 0 : i32
      %171 = tpu.memref_slice %arg4[%c0_i32_133, %c0_i32_134] : memref<100x128xf32, #tpu.memory_space<any>> -> memref<1x128xf32, #tpu.memory_space<any>>
      %c0_i32_135 = arith.constant 0 : i32
      %172 = tpu.memref_slice %arg5[%98, %c0_i32_135] : memref<16x128xf32, #tpu.memory_space<vmem>> -> memref<1x128xf32, #tpu.memory_space<vmem>>
      %173 = tpu.memref_slice %arg6[%c0_i32_132] : memref<2x!tpu.dma_semaphore, #tpu.memory_space<semaphore_mem>> -> memref<1x!tpu.dma_semaphore, #tpu.memory_space<semaphore_mem>>
      %174 = tpu.memref_squeeze %173 : memref<1x!tpu.dma_semaphore, #tpu.memory_space<semaphore_mem>> -> memref<!tpu.dma_semaphore, #tpu.memory_space<semaphore_mem>>
      tpu.wait_dma2 semaphore(%174 : memref<!tpu.dma_semaphore, #tpu.memory_space<semaphore_mem>>) src(%171 : memref<1x128xf32, #tpu.memory_space<any>>) dst(%172 : memref<1x128xf32, #tpu.memory_space<vmem>>)
    } else {
    }
    %c4_i32_72 = arith.constant 4 : i32
    %c0_i32_73 = arith.constant 0 : i32
    %103 = arith.addi %c0_i32_73, %c4_i32_72 : i32
    %104 = arith.addi %0, %103 : i32
    %c24_i32_74 = arith.constant 24 : i32
    %105 = arith.cmpi slt, %104, %c24_i32_74 : i32
    %106 = arith.extui %105 : i1 to i32
    %c0_i32_75 = arith.constant 0 : i32
    %107 = arith.cmpi ne, %106, %c0_i32_75 : i32
    scf.if %107 {
      %c0_i32_132 = arith.constant 0 : i32
      %c0_i32_133 = arith.constant 0 : i32
      %c0_i32_134 = arith.constant 0 : i32
      %171 = tpu.memref_slice %arg4[%c0_i32_133, %c0_i32_134] : memref<100x128xf32, #tpu.memory_space<any>> -> memref<1x128xf32, #tpu.memory_space<any>>
      %c0_i32_135 = arith.constant 0 : i32
      %172 = tpu.memref_slice %arg5[%103, %c0_i32_135] : memref<16x128xf32, #tpu.memory_space<vmem>> -> memref<1x128xf32, #tpu.memory_space<vmem>>
      %173 = tpu.memref_slice %arg6[%c0_i32_132] : memref<2x!tpu.dma_semaphore, #tpu.memory_space<semaphore_mem>> -> memref<1x!tpu.dma_semaphore, #tpu.memory_space<semaphore_mem>>
      %174 = tpu.memref_squeeze %173 : memref<1x!tpu.dma_semaphore, #tpu.memory_space<semaphore_mem>> -> memref<!tpu.dma_semaphore, #tpu.memory_space<semaphore_mem>>
      tpu.wait_dma2 semaphore(%174 : memref<!tpu.dma_semaphore, #tpu.memory_space<semaphore_mem>>) src(%171 : memref<1x128xf32, #tpu.memory_space<any>>) dst(%172 : memref<1x128xf32, #tpu.memory_space<vmem>>)
    } else {
    }
    %c5_i32_76 = arith.constant 5 : i32
    %c0_i32_77 = arith.constant 0 : i32
    %108 = arith.addi %c0_i32_77, %c5_i32_76 : i32
    %109 = arith.addi %0, %108 : i32
    %c24_i32_78 = arith.constant 24 : i32
    %110 = arith.cmpi slt, %109, %c24_i32_78 : i32
    %111 = arith.extui %110 : i1 to i32
    %c0_i32_79 = arith.constant 0 : i32
    %112 = arith.cmpi ne, %111, %c0_i32_79 : i32
    scf.if %112 {
      %c0_i32_132 = arith.constant 0 : i32
      %c0_i32_133 = arith.constant 0 : i32
      %c0_i32_134 = arith.constant 0 : i32
      %171 = tpu.memref_slice %arg4[%c0_i32_133, %c0_i32_134] : memref<100x128xf32, #tpu.memory_space<any>> -> memref<1x128xf32, #tpu.memory_space<any>>
      %c0_i32_135 = arith.constant 0 : i32
      %172 = tpu.memref_slice %arg5[%108, %c0_i32_135] : memref<16x128xf32, #tpu.memory_space<vmem>> -> memref<1x128xf32, #tpu.memory_space<vmem>>
      %173 = tpu.memref_slice %arg6[%c0_i32_132] : memref<2x!tpu.dma_semaphore, #tpu.memory_space<semaphore_mem>> -> memref<1x!tpu.dma_semaphore, #tpu.memory_space<semaphore_mem>>
      %174 = tpu.memref_squeeze %173 : memref<1x!tpu.dma_semaphore, #tpu.memory_space<semaphore_mem>> -> memref<!tpu.dma_semaphore, #tpu.memory_space<semaphore_mem>>
      tpu.wait_dma2 semaphore(%174 : memref<!tpu.dma_semaphore, #tpu.memory_space<semaphore_mem>>) src(%171 : memref<1x128xf32, #tpu.memory_space<any>>) dst(%172 : memref<1x128xf32, #tpu.memory_space<vmem>>)
    } else {
    }
    %c6_i32_80 = arith.constant 6 : i32
    %c0_i32_81 = arith.constant 0 : i32
    %113 = arith.addi %c0_i32_81, %c6_i32_80 : i32
    %114 = arith.addi %0, %113 : i32
    %c24_i32_82 = arith.constant 24 : i32
    %115 = arith.cmpi slt, %114, %c24_i32_82 : i32
    %116 = arith.extui %115 : i1 to i32
    %c0_i32_83 = arith.constant 0 : i32
    %117 = arith.cmpi ne, %116, %c0_i32_83 : i32
    scf.if %117 {
      %c0_i32_132 = arith.constant 0 : i32
      %c0_i32_133 = arith.constant 0 : i32
      %c0_i32_134 = arith.constant 0 : i32
      %171 = tpu.memref_slice %arg4[%c0_i32_133, %c0_i32_134] : memref<100x128xf32, #tpu.memory_space<any>> -> memref<1x128xf32, #tpu.memory_space<any>>
      %c0_i32_135 = arith.constant 0 : i32
      %172 = tpu.memref_slice %arg5[%113, %c0_i32_135] : memref<16x128xf32, #tpu.memory_space<vmem>> -> memref<1x128xf32, #tpu.memory_space<vmem>>
      %173 = tpu.memref_slice %arg6[%c0_i32_132] : memref<2x!tpu.dma_semaphore, #tpu.memory_space<semaphore_mem>> -> memref<1x!tpu.dma_semaphore, #tpu.memory_space<semaphore_mem>>
      %174 = tpu.memref_squeeze %173 : memref<1x!tpu.dma_semaphore, #tpu.memory_space<semaphore_mem>> -> memref<!tpu.dma_semaphore, #tpu.memory_space<semaphore_mem>>
      tpu.wait_dma2 semaphore(%174 : memref<!tpu.dma_semaphore, #tpu.memory_space<semaphore_mem>>) src(%171 : memref<1x128xf32, #tpu.memory_space<any>>) dst(%172 : memref<1x128xf32, #tpu.memory_space<vmem>>)
    } else {
    }
    %c7_i32_84 = arith.constant 7 : i32
    %c0_i32_85 = arith.constant 0 : i32
    %118 = arith.addi %c0_i32_85, %c7_i32_84 : i32
    %119 = arith.addi %0, %118 : i32
    %c24_i32_86 = arith.constant 24 : i32
    %120 = arith.cmpi slt, %119, %c24_i32_86 : i32
    %121 = arith.extui %120 : i1 to i32
    %c0_i32_87 = arith.constant 0 : i32
    %122 = arith.cmpi ne, %121, %c0_i32_87 : i32
    scf.if %122 {
      %c0_i32_132 = arith.constant 0 : i32
      %c0_i32_133 = arith.constant 0 : i32
      %c0_i32_134 = arith.constant 0 : i32
      %171 = tpu.memref_slice %arg4[%c0_i32_133, %c0_i32_134] : memref<100x128xf32, #tpu.memory_space<any>> -> memref<1x128xf32, #tpu.memory_space<any>>
      %c0_i32_135 = arith.constant 0 : i32
      %172 = tpu.memref_slice %arg5[%118, %c0_i32_135] : memref<16x128xf32, #tpu.memory_space<vmem>> -> memref<1x128xf32, #tpu.memory_space<vmem>>
      %173 = tpu.memref_slice %arg6[%c0_i32_132] : memref<2x!tpu.dma_semaphore, #tpu.memory_space<semaphore_mem>> -> memref<1x!tpu.dma_semaphore, #tpu.memory_space<semaphore_mem>>
      %174 = tpu.memref_squeeze %173 : memref<1x!tpu.dma_semaphore, #tpu.memory_space<semaphore_mem>> -> memref<!tpu.dma_semaphore, #tpu.memory_space<semaphore_mem>>
      tpu.wait_dma2 semaphore(%174 : memref<!tpu.dma_semaphore, #tpu.memory_space<semaphore_mem>>) src(%171 : memref<1x128xf32, #tpu.memory_space<any>>) dst(%172 : memref<1x128xf32, #tpu.memory_space<vmem>>)
    } else {
    }
    %c8_i32_88 = arith.constant 8 : i32
    %c0 = arith.constant 0 : index
    %c0_89 = arith.constant 0 : index
    %123 = vector.load %arg5[%c0, %c0_89] : memref<16x128xf32, #tpu.memory_space<vmem>>, vector<8x128xf32>
    %c0_90 = arith.constant 0 : index
    %c0_91 = arith.constant 0 : index
    %124 = vector.load %arg3[%c0_90, %c0_91] : memref<16x128xf32, #tpu.memory_space<vmem>>, vector<8x128xf32>
    %125 = arith.addf %123, %124 : vector<8x128xf32>
    %c0_92 = arith.constant 0 : index
    %c0_93 = arith.constant 0 : index
    %126 = vector.load %arg5[%c0_92, %c0_93] : memref<16x128xf32, #tpu.memory_space<vmem>>, vector<8x128xf32>
    tpu.vector_store %arg5[%c0_92, %c0_93], %125 {strides = array<i32>} : memref<16x128xf32, #tpu.memory_space<vmem>>, vector<8x128xf32>,
    %c0_i32_94 = arith.constant 0 : i32
    %c8_i32_95 = arith.constant 8 : i32
    %127 = arith.addi %c8_i32_95, %c0_i32_94 : i32
    %128 = arith.addi %0, %127 : i32
    %c24_i32_96 = arith.constant 24 : i32
    %129 = arith.cmpi slt, %128, %c24_i32_96 : i32
    %130 = arith.extui %129 : i1 to i32
    %c0_i32_97 = arith.constant 0 : i32
    %131 = arith.cmpi ne, %130, %c0_i32_97 : i32
    scf.if %131 {
      %c1_i32_132 = arith.constant 1 : i32
      %c0_i32_133 = arith.constant 0 : i32
      %c0_i32_134 = arith.constant 0 : i32
      %171 = tpu.memref_slice %arg4[%c0_i32_133, %c0_i32_134] : memref<100x128xf32, #tpu.memory_space<any>> -> memref<1x128xf32, #tpu.memory_space<any>>
      %c0_i32_135 = arith.constant 0 : i32
      %172 = tpu.memref_slice %arg5[%127, %c0_i32_135] : memref<16x128xf32, #tpu.memory_space<vmem>> -> memref<1x128xf32, #tpu.memory_space<vmem>>
      %173 = tpu.memref_slice %arg6[%c1_i32_132] : memref<2x!tpu.dma_semaphore, #tpu.memory_space<semaphore_mem>> -> memref<1x!tpu.dma_semaphore, #tpu.memory_space<semaphore_mem>>
      %174 = tpu.memref_squeeze %173 : memref<1x!tpu.dma_semaphore, #tpu.memory_space<semaphore_mem>> -> memref<!tpu.dma_semaphore, #tpu.memory_space<semaphore_mem>>
      tpu.wait_dma2 semaphore(%174 : memref<!tpu.dma_semaphore, #tpu.memory_space<semaphore_mem>>) src(%171 : memref<1x128xf32, #tpu.memory_space<any>>) dst(%172 : memref<1x128xf32, #tpu.memory_space<vmem>>)
    } else {
    }
    %c1_i32_98 = arith.constant 1 : i32
    %c8_i32_99 = arith.constant 8 : i32
    %132 = arith.addi %c8_i32_99, %c1_i32_98 : i32
    %133 = arith.addi %0, %132 : i32
    %c24_i32_100 = arith.constant 24 : i32
    %134 = arith.cmpi slt, %133, %c24_i32_100 : i32
    %135 = arith.extui %134 : i1 to i32
    %c0_i32_101 = arith.constant 0 : i32
    %136 = arith.cmpi ne, %135, %c0_i32_101 : i32
    scf.if %136 {
      %c1_i32_132 = arith.constant 1 : i32
      %c0_i32_133 = arith.constant 0 : i32
      %c0_i32_134 = arith.constant 0 : i32
      %171 = tpu.memref_slice %arg4[%c0_i32_133, %c0_i32_134] : memref<100x128xf32, #tpu.memory_space<any>> -> memref<1x128xf32, #tpu.memory_space<any>>
      %c0_i32_135 = arith.constant 0 : i32
      %172 = tpu.memref_slice %arg5[%132, %c0_i32_135] : memref<16x128xf32, #tpu.memory_space<vmem>> -> memref<1x128xf32, #tpu.memory_space<vmem>>
      %173 = tpu.memref_slice %arg6[%c1_i32_132] : memref<2x!tpu.dma_semaphore, #tpu.memory_space<semaphore_mem>> -> memref<1x!tpu.dma_semaphore, #tpu.memory_space<semaphore_mem>>
      %174 = tpu.memref_squeeze %173 : memref<1x!tpu.dma_semaphore, #tpu.memory_space<semaphore_mem>> -> memref<!tpu.dma_semaphore, #tpu.memory_space<semaphore_mem>>
      tpu.wait_dma2 semaphore(%174 : memref<!tpu.dma_semaphore, #tpu.memory_space<semaphore_mem>>) src(%171 : memref<1x128xf32, #tpu.memory_space<any>>) dst(%172 : memref<1x128xf32, #tpu.memory_space<vmem>>)
    } else {
    }
    %c2_i32_102 = arith.constant 2 : i32
    %c8_i32_103 = arith.constant 8 : i32
    %137 = arith.addi %c8_i32_103, %c2_i32_102 : i32
    %138 = arith.addi %0, %137 : i32
    %c24_i32_104 = arith.constant 24 : i32
    %139 = arith.cmpi slt, %138, %c24_i32_104 : i32
    %140 = arith.extui %139 : i1 to i32
    %c0_i32_105 = arith.constant 0 : i32
    %141 = arith.cmpi ne, %140, %c0_i32_105 : i32
    scf.if %141 {
      %c1_i32_132 = arith.constant 1 : i32
      %c0_i32_133 = arith.constant 0 : i32
      %c0_i32_134 = arith.constant 0 : i32
      %171 = tpu.memref_slice %arg4[%c0_i32_133, %c0_i32_134] : memref<100x128xf32, #tpu.memory_space<any>> -> memref<1x128xf32, #tpu.memory_space<any>>
      %c0_i32_135 = arith.constant 0 : i32
      %172 = tpu.memref_slice %arg5[%137, %c0_i32_135] : memref<16x128xf32, #tpu.memory_space<vmem>> -> memref<1x128xf32, #tpu.memory_space<vmem>>
      %173 = tpu.memref_slice %arg6[%c1_i32_132] : memref<2x!tpu.dma_semaphore, #tpu.memory_space<semaphore_mem>> -> memref<1x!tpu.dma_semaphore, #tpu.memory_space<semaphore_mem>>
      %174 = tpu.memref_squeeze %173 : memref<1x!tpu.dma_semaphore, #tpu.memory_space<semaphore_mem>> -> memref<!tpu.dma_semaphore, #tpu.memory_space<semaphore_mem>>
      tpu.wait_dma2 semaphore(%174 : memref<!tpu.dma_semaphore, #tpu.memory_space<semaphore_mem>>) src(%171 : memref<1x128xf32, #tpu.memory_space<any>>) dst(%172 : memref<1x128xf32, #tpu.memory_space<vmem>>)
    } else {
    }
    %c3_i32_106 = arith.constant 3 : i32
    %c8_i32_107 = arith.constant 8 : i32
    %142 = arith.addi %c8_i32_107, %c3_i32_106 : i32
    %143 = arith.addi %0, %142 : i32
    %c24_i32_108 = arith.constant 24 : i32
    %144 = arith.cmpi slt, %143, %c24_i32_108 : i32
    %145 = arith.extui %144 : i1 to i32
    %c0_i32_109 = arith.constant 0 : i32
    %146 = arith.cmpi ne, %145, %c0_i32_109 : i32
    scf.if %146 {
      %c1_i32_132 = arith.constant 1 : i32
      %c0_i32_133 = arith.constant 0 : i32
      %c0_i32_134 = arith.constant 0 : i32
      %171 = tpu.memref_slice %arg4[%c0_i32_133, %c0_i32_134] : memref<100x128xf32, #tpu.memory_space<any>> -> memref<1x128xf32, #tpu.memory_space<any>>
      %c0_i32_135 = arith.constant 0 : i32
      %172 = tpu.memref_slice %arg5[%142, %c0_i32_135] : memref<16x128xf32, #tpu.memory_space<vmem>> -> memref<1x128xf32, #tpu.memory_space<vmem>>
      %173 = tpu.memref_slice %arg6[%c1_i32_132] : memref<2x!tpu.dma_semaphore, #tpu.memory_space<semaphore_mem>> -> memref<1x!tpu.dma_semaphore, #tpu.memory_space<semaphore_mem>>
      %174 = tpu.memref_squeeze %173 : memref<1x!tpu.dma_semaphore, #tpu.memory_space<semaphore_mem>> -> memref<!tpu.dma_semaphore, #tpu.memory_space<semaphore_mem>>
      tpu.wait_dma2 semaphore(%174 : memref<!tpu.dma_semaphore, #tpu.memory_space<semaphore_mem>>) src(%171 : memref<1x128xf32, #tpu.memory_space<any>>) dst(%172 : memref<1x128xf32, #tpu.memory_space<vmem>>)
    } else {
    }
    %c4_i32_110 = arith.constant 4 : i32
    %c8_i32_111 = arith.constant 8 : i32
    %147 = arith.addi %c8_i32_111, %c4_i32_110 : i32
    %148 = arith.addi %0, %147 : i32
    %c24_i32_112 = arith.constant 24 : i32
    %149 = arith.cmpi slt, %148, %c24_i32_112 : i32
    %150 = arith.extui %149 : i1 to i32
    %c0_i32_113 = arith.constant 0 : i32
    %151 = arith.cmpi ne, %150, %c0_i32_113 : i32
    scf.if %151 {
      %c1_i32_132 = arith.constant 1 : i32
      %c0_i32_133 = arith.constant 0 : i32
      %c0_i32_134 = arith.constant 0 : i32
      %171 = tpu.memref_slice %arg4[%c0_i32_133, %c0_i32_134] : memref<100x128xf32, #tpu.memory_space<any>> -> memref<1x128xf32, #tpu.memory_space<any>>
      %c0_i32_135 = arith.constant 0 : i32
      %172 = tpu.memref_slice %arg5[%147, %c0_i32_135] : memref<16x128xf32, #tpu.memory_space<vmem>> -> memref<1x128xf32, #tpu.memory_space<vmem>>
      %173 = tpu.memref_slice %arg6[%c1_i32_132] : memref<2x!tpu.dma_semaphore, #tpu.memory_space<semaphore_mem>> -> memref<1x!tpu.dma_semaphore, #tpu.memory_space<semaphore_mem>>
      %174 = tpu.memref_squeeze %173 : memref<1x!tpu.dma_semaphore, #tpu.memory_space<semaphore_mem>> -> memref<!tpu.dma_semaphore, #tpu.memory_space<semaphore_mem>>
      tpu.wait_dma2 semaphore(%174 : memref<!tpu.dma_semaphore, #tpu.memory_space<semaphore_mem>>) src(%171 : memref<1x128xf32, #tpu.memory_space<any>>) dst(%172 : memref<1x128xf32, #tpu.memory_space<vmem>>)
    } else {
    }
    %c5_i32_114 = arith.constant 5 : i32
    %c8_i32_115 = arith.constant 8 : i32
    %152 = arith.addi %c8_i32_115, %c5_i32_114 : i32
    %153 = arith.addi %0, %152 : i32
    %c24_i32_116 = arith.constant 24 : i32
    %154 = arith.cmpi slt, %153, %c24_i32_116 : i32
    %155 = arith.extui %154 : i1 to i32
    %c0_i32_117 = arith.constant 0 : i32
    %156 = arith.cmpi ne, %155, %c0_i32_117 : i32
    scf.if %156 {
      %c1_i32_132 = arith.constant 1 : i32
      %c0_i32_133 = arith.constant 0 : i32
      %c0_i32_134 = arith.constant 0 : i32
      %171 = tpu.memref_slice %arg4[%c0_i32_133, %c0_i32_134] : memref<100x128xf32, #tpu.memory_space<any>> -> memref<1x128xf32, #tpu.memory_space<any>>
      %c0_i32_135 = arith.constant 0 : i32
      %172 = tpu.memref_slice %arg5[%152, %c0_i32_135] : memref<16x128xf32, #tpu.memory_space<vmem>> -> memref<1x128xf32, #tpu.memory_space<vmem>>
      %173 = tpu.memref_slice %arg6[%c1_i32_132] : memref<2x!tpu.dma_semaphore, #tpu.memory_space<semaphore_mem>> -> memref<1x!tpu.dma_semaphore, #tpu.memory_space<semaphore_mem>>
      %174 = tpu.memref_squeeze %173 : memref<1x!tpu.dma_semaphore, #tpu.memory_space<semaphore_mem>> -> memref<!tpu.dma_semaphore, #tpu.memory_space<semaphore_mem>>
      tpu.wait_dma2 semaphore(%174 : memref<!tpu.dma_semaphore, #tpu.memory_space<semaphore_mem>>) src(%171 : memref<1x128xf32, #tpu.memory_space<any>>) dst(%172 : memref<1x128xf32, #tpu.memory_space<vmem>>)
    } else {
    }
    %c6_i32_118 = arith.constant 6 : i32
    %c8_i32_119 = arith.constant 8 : i32
    %157 = arith.addi %c8_i32_119, %c6_i32_118 : i32
    %158 = arith.addi %0, %157 : i32
    %c24_i32_120 = arith.constant 24 : i32
    %159 = arith.cmpi slt, %158, %c24_i32_120 : i32
    %160 = arith.extui %159 : i1 to i32
    %c0_i32_121 = arith.constant 0 : i32
    %161 = arith.cmpi ne, %160, %c0_i32_121 : i32
    scf.if %161 {
      %c1_i32_132 = arith.constant 1 : i32
      %c0_i32_133 = arith.constant 0 : i32
      %c0_i32_134 = arith.constant 0 : i32
      %171 = tpu.memref_slice %arg4[%c0_i32_133, %c0_i32_134] : memref<100x128xf32, #tpu.memory_space<any>> -> memref<1x128xf32, #tpu.memory_space<any>>
      %c0_i32_135 = arith.constant 0 : i32
      %172 = tpu.memref_slice %arg5[%157, %c0_i32_135] : memref<16x128xf32, #tpu.memory_space<vmem>> -> memref<1x128xf32, #tpu.memory_space<vmem>>
      %173 = tpu.memref_slice %arg6[%c1_i32_132] : memref<2x!tpu.dma_semaphore, #tpu.memory_space<semaphore_mem>> -> memref<1x!tpu.dma_semaphore, #tpu.memory_space<semaphore_mem>>
      %174 = tpu.memref_squeeze %173 : memref<1x!tpu.dma_semaphore, #tpu.memory_space<semaphore_mem>> -> memref<!tpu.dma_semaphore, #tpu.memory_space<semaphore_mem>>
      tpu.wait_dma2 semaphore(%174 : memref<!tpu.dma_semaphore, #tpu.memory_space<semaphore_mem>>) src(%171 : memref<1x128xf32, #tpu.memory_space<any>>) dst(%172 : memref<1x128xf32, #tpu.memory_space<vmem>>)
    } else {
    }
    %c7_i32_122 = arith.constant 7 : i32
    %c8_i32_123 = arith.constant 8 : i32
    %162 = arith.addi %c8_i32_123, %c7_i32_122 : i32
    %163 = arith.addi %0, %162 : i32
    %c24_i32_124 = arith.constant 24 : i32
    %164 = arith.cmpi slt, %163, %c24_i32_124 : i32
    %165 = arith.extui %164 : i1 to i32
    %c0_i32_125 = arith.constant 0 : i32
    %166 = arith.cmpi ne, %165, %c0_i32_125 : i32
    scf.if %166 {
      %c1_i32_132 = arith.constant 1 : i32
      %c0_i32_133 = arith.constant 0 : i32
      %c0_i32_134 = arith.constant 0 : i32
      %171 = tpu.memref_slice %arg4[%c0_i32_133, %c0_i32_134] : memref<100x128xf32, #tpu.memory_space<any>> -> memref<1x128xf32, #tpu.memory_space<any>>
      %c0_i32_135 = arith.constant 0 : i32
      %172 = tpu.memref_slice %arg5[%162, %c0_i32_135] : memref<16x128xf32, #tpu.memory_space<vmem>> -> memref<1x128xf32, #tpu.memory_space<vmem>>
      %173 = tpu.memref_slice %arg6[%c1_i32_132] : memref<2x!tpu.dma_semaphore, #tpu.memory_space<semaphore_mem>> -> memref<1x!tpu.dma_semaphore, #tpu.memory_space<semaphore_mem>>
      %174 = tpu.memref_squeeze %173 : memref<1x!tpu.dma_semaphore, #tpu.memory_space<semaphore_mem>> -> memref<!tpu.dma_semaphore, #tpu.memory_space<semaphore_mem>>
      tpu.wait_dma2 semaphore(%174 : memref<!tpu.dma_semaphore, #tpu.memory_space<semaphore_mem>>) src(%171 : memref<1x128xf32, #tpu.memory_space<any>>) dst(%172 : memref<1x128xf32, #tpu.memory_space<vmem>>)
    } else {
    }
    %c8_i32_126 = arith.constant 8 : i32
    %c8 = arith.constant 8 : index
    %c0_127 = arith.constant 0 : index
    %167 = vector.load %arg5[%c8, %c0_127] : memref<16x128xf32, #tpu.memory_space<vmem>>, vector<8x128xf32>
    %c8_128 = arith.constant 8 : index
    %c0_129 = arith.constant 0 : index
    %168 = vector.load %arg3[%c8_128, %c0_129] : memref<16x128xf32, #tpu.memory_space<vmem>>, vector<8x128xf32>
    %169 = arith.addf %167, %168 : vector<8x128xf32>
    %c8_130 = arith.constant 8 : index
    %c0_131 = arith.constant 0 : index
    %170 = vector.load %arg5[%c8_130, %c0_131] : memref<16x128xf32, #tpu.memory_space<vmem>>, vector<8x128xf32>
    tpu.vector_store %arg5[%c8_130, %c0_131], %169 {strides = array<i32>} : memref<16x128xf32, #tpu.memory_space<vmem>>, vector<8x128xf32>,
    return
  }
  func.func @transform_0(%arg0: i32, %arg1: i32, %arg2: memref<64xi32, #tpu.memory_space<smem>>) -> (i32, i32) {
    %c0_i32 = arith.constant 0 : i32
    %c0_i32_0 = arith.constant 0 : i32
    return %arg0, %c0_i32 : i32, i32
  }
  func.func @transform_2(%arg0: i32, %arg1: i32, %arg2: memref<64xi32, #tpu.memory_space<smem>>) -> (i32, i32) {
    %c2_i32 = arith.constant 2 : i32
    %0 = arith.muli %arg1, %c2_i32 : i32
    %1 = arith.addi %0, %arg0 : i32
    %c0_i32 = arith.constant 0 : i32
    %c0_i32_0 = arith.constant 0 : i32
    return %1, %c0_i32 : i32, i32
  }
}

</mosaic_0001>

<bundles_post_ra>
// kernel: embeddings_forward.1
= control target key start
LH: loop header
LB: loop body
LE: loop exit
PB: predicated region body
PF: predicated region fallthrough
CT: control target
= control target key end

     0   :  { %s2175_s0 = inlined_call_operand.vmem [shape: s32[64], index: 0, kind: input, shape index: {}]   ;;  %s2176_s1 = inlined_call_operand.vmem [shape: f32[32,128], index: 1, kind: input, shape index: {}]   ;;  %s2177_s2 = inlined_call_operand.hbm [shape: f32[100,128], index: 2, kind: input, shape index: {}]   ;;  %s2178_s3 = inlined_call_operand.vmem [shape: f32[64,128], index: 3, kind: output, shape index: {}]  }
   0x1   :  { %2221 = sst [smem:[#allocation82_spill]] %s2176_s1  ;;  %s8_s14 = sshll.u32 %s2175_s0, 4  ;;  %s9_s14 = int_to_ptr.vmem [resolvable:$true] %s8_s14 }
   0x2   :  { %2222 = sst [smem:[#allocation83_spill]] %s2178_s3  ;;  %s960_s15 = scalar_lea.vmem %s9_s14, 16 }
   0x3   :  { %p961_p0 = scmp.ne.s32.totalorder %s9_s14, %s960_s15  ;;  %p965_p1 = scmp.lt.s32.totalorder %s9_s14, %s9_s14 }
   0x4   :  { %p966_p2 = scmp.lt.s32.totalorder %s960_s15, %s960_s15 }
   0x6   :  { %p967_p3 = por %p966_p2, %p965_p1 }
   0x8   :  { %p968_p4 = pnand %p967_p3, %p961_p0 }
   0xa   :  { %971 = shalt.err (!%p968_p4)  }
   0xb   :  { %s1494_s16 = smov [#allocation4]  }
   0xc   :  { %11 = dma.vmem_to_smem %s9_s14, 16, %s1494_s16, [#allocation3] }
   0xd   :  { %1408 = dma.done.wait [#allocation3], 16 }
   0xe   :  { %1409 = vsyncadd [#allocation3], 4294967280 }
   0xf   :  { %13 = sfence }
  0x10   :  { %s1518_s17 = smov 0   ;;  %s1520_s18 = smov 0  }
  0x11   :  { %s1522_s19 = smov 0   ;;  %s1524_s0 = smov 0  }
  0x12   :  { %s1526_s20 = smov 0  }
  0x13 LB: > { %2223 = sst [smem:[#allocation72_spill]] %s1484_s19  ;;  %s28_s21 = sadd.s32 1, %s1484_s19  ;;  %s1492_s20 = sphi %s1526_s20, %s19_s20   ;;  %s1488_s0 = sphi %s1524_s0, %s2280_s0   ;;  %s1484_s19 = sphi %s1522_s19, %s2279_s19   ;;  %s1480_s18 = sphi %s1520_s18, %s2278_s18   ;;  %s1476_s17 = sphi %s1518_s17, %s2277_s17  }
  0x14   : > { %2224 = sst [smem:[#allocation73_spill]] %s1488_s0  ;;  %s31_s22 = sadd.s32 1, %s1488_s0 }
  0x15   : > { %2225 = sst [smem:[#allocation74_spill]] %s1492_s20  ;;  %p29_p5 = scmp.ge.s32.totalorder %s28_s21, 2 }
  0x16   : > { %p731_p6 = scmp.ge.s32.totalorder %s1492_s20, 1  ;;  %p112_p7 = scmp.lt.s32.totalorder %s1492_s20, 5 }
  0x17   : > { %s2282_s21 = smov (%p29_p5, %s28_s21), 0  ;;  %s2284_s22 = smov (!%p29_p5, %s31_s22), %s1488_s0 }
  0x18   : > { %2226 = sst [smem:[#allocation75_spill]] %s2282_s21  ;;  %p113_p8 = pnand %p731_p6, %p112_p7 }
  0x19   : > { %p33_p9 = scmp.ge.s32.totalorder %s2284_s22, 2 }
  0x1a   : > { %116 = sbr.rel (%p113_p8) target bundleno = 566 (0x236), region = 24 }
  0x1b   : > { %s2286_s22 = smov (%p33_p9, %s2284_s22), 0 }
  0x1c   : > { %2227 = sst [smem:[#allocation76_spill]] %s2286_s22 }
  0x1f   : > { %s732_s23 = sshll.u32 %s1480_s18, 1  ;;  %s734_s24 = sshll.u32 %s1476_s17, 1 }
  0x20   : > { %p135_p10 = scmp.lt.s32.totalorder %s732_s23, 3  ;;  %s141_s25 = sadd.s32 %s1480_s18, %s734_s24 }
  0x21   : > { %s735_s26 = sshll.u32 %s141_s25, 1  ;;  %s1548_s27 = sshll.u32 %s1480_s18, 4 }
  0x22   : > { %s2288_s23 = smov (!%p135_p10, %s732_s23), 3  ;;  %p143_p11 = scmp.lt.s32.totalorder %s735_s26, 7 }
  0x23   : > { %s738_s28 = sshll.u32 %s1476_s17, 5  ;;  %s733_s29 = sshll.u32 %s2288_s23, 3 }
  0x24   : > { %s1551_s30 = sadd.s32 %s738_s28, %s1548_s27  ;;  %s2228_s1 = sld [smem:[#allocation82_spill]] }
  0x25   : > { %s2290_s26 = smov (!%p143_p11, %s735_s26), 7  ;;  %p2179_p12 = scmp.lt.s32.totalorder %s1548_s27, 24 }
  0x26   : > { %s171_s7 = sadd.s32 1, %s1548_s27  ;;  %s736_s8 = sshll.u32 %s2290_s26, 3 }
  0x27   : > { %s2230_s3 = sld [smem:[#allocation83_spill]]  ;;  %p1565_p13 = scmp.lt.s32.totalorder %s171_s7, 24 }
  0x28   : > { %s792_s13 = scalar_select %p2179_p12, [#allocation4], [#allocation39] }
  0x29   : > { %s2231_s12 = scalar_select %p1565_p13, 1, 0 }
  0x2a   : > { %s1556_s6 = scalar_lea.vmem %s2228_s1, %s733_s29  ;;  %s176_s16 = sadd.s32 1, %s1551_s30 }
  0x2b   : > { %2229 = sst [smem:[#allocation77_spill]] %s1556_s6  ;;  %s2292_s16 = smov (!%p1565_p13, %s176_s16), 0 }
  0x2c   : > { %s793_s14 = scalar_select %p2179_p12, %s1551_s30, 0 }
  0x2d   : > { %s1563_s11 = scalar_lea.vmem %s2230_s3, %s736_s8  ;;  %s192_s24 = sadd.s32 2, %s1548_s27 }
  0x2e   : > { %s167_s15 = sshll.u32 %s1563_s11, 4  ;;  %s157_s17 = sld [smem:[%s792_s13 + %s793_s14]]  ;;  %s1576_s15 = int_to_ptr.vmem [resolvable:$true] %s167_s15 }
  0x2f   : > { %s796_s18 = scalar_select %p1565_p13, [#allocation4], [#allocation40] }
  0x30   : > { %s180_s23 = scalar_lea.vmem %s1563_s11, 1  ;;  %p1588_p0 = scmp.lt.s32.totalorder %s192_s24, 24 }
  0x31   : > { %s1584_s25 = sld [smem:[%s796_s18 + %s2292_s16]]  ;;  %s188_s26 = sshll.u32 %s180_s23, 4  ;;  %s1586_s26 = int_to_ptr.vmem [resolvable:$true] %s188_s26 }
  0x32   : > { %s2232_s29 = scalar_select %p1588_p0, 1, 0 }
  0x33   : > { %s1601_s14 = scalar_lea.hbm %s2177_s2, 1664 }
  0x34   : > { %s740_s28 = sshll.u32 %s157_s17, 4 }
  0x35   : > { %s159_s7 = scalar_lea.hbm %s2177_s2, %s740_s28 }
  0x36   : > { %s972_s9 = scalar_lea.hbm %s159_s7, 16  ;;  %p977_p4 = scmp.lt.s32.totalorder %s159_s7, %s2177_s2 }
  0x37   : > { %p973_p1 = scmp.ne.s32.totalorder %s159_s7, %s972_s9  ;;  %p978_p5 = scmp.lt.s32.totalorder %s1601_s14, %s972_s9 }
  0x39   : > { %p974_p2 = pnand %p973_p1, %p2179_p12  ;;  %p979_p6 = por %p978_p5, %p977_p4 }
  0x3b   : > { %p975_p3 = pneg %p974_p2 }
  0x3d   : > { %p980_p7 = pnand %p979_p6, %p975_p3 }
  0x3f   : > { %983 = shalt.err (!%p980_p7)  }
  0x40   : > { %s984_s18 = scalar_lea.vmem %s1576_s15, 16  ;;  %s988_s28 = sshll.u32 %s2230_s3, 4  ;;  %s1614_s28 = int_to_ptr.vmem [resolvable:$false] %s988_s28 }
  0x41   : > { %p985_p8 = scmp.ne.s32.totalorder %s1576_s15, %s984_s18  ;;  %s1617_s4 = scalar_lea.vmem %s1614_s28, 1024 }
  0x42   : > { %p991_p11 = scmp.lt.s32.totalorder %s1576_s15, %s1614_s28  ;;  %p992_p1 = scmp.lt.s32.totalorder %s1617_s4, %s984_s18 }
  0x43   : > { %p986_p9 = pnand %p985_p8, %p2179_p12 }
  0x44   : > { %p993_p2 = por %p992_p1, %p991_p11 }
  0x45   : > { %p987_p10 = pneg %p986_p9 }
  0x47   : > { %p994_p3 = pnand %p993_p2, %p987_p10 }
  0x49   : > { %997 = shalt.err (!%p994_p3)  }
  0x4a   : > { %794 = dma.hbm_to_vmem [thread:$0]  (%p2179_p12), %s159_s7, 16, %s1576_s15, [#allocation2] }
  0x4b   : > { %s800_s5 = scalar_select %p1588_p0, [#allocation4], [#allocation41] }
  0x4c   : > { %s742_s9 = sshll.u32 %s1584_s25, 4  ;;  %s201_s10 = scalar_lea.vmem %s1563_s11, 2 }
  0x4d   : > { %s179_s17 = scalar_lea.hbm %s2177_s2, %s742_s9  ;;  %s209_s18 = sshll.u32 %s201_s10, 4  ;;  %s1652_s18 = int_to_ptr.vmem [resolvable:$true] %s209_s18 }
  0x4e   : > { %s998_s23 = scalar_lea.hbm %s179_s17, 16  ;;  %p1003_p7 = scmp.lt.s32.totalorder %s179_s17, %s2177_s2 }
  0x4f   : > { %p999_p4 = scmp.ne.s32.totalorder %s179_s17, %s998_s23  ;;  %p1004_p8 = scmp.lt.s32.totalorder %s1601_s14, %s998_s23 }
  0x51   : > { %p1000_p5 = pnand %p999_p4, %p1565_p13  ;;  %p1005_p9 = por %p1004_p8, %p1003_p7 }
  0x53   : > { %p1001_p6 = pneg %p1000_p5 }
  0x55   : > { %p1006_p10 = pnand %p1005_p9, %p1001_p6 }
  0x57   : > { %1009 = shalt.err (!%p1006_p10)  }
  0x58   : > { %s1010_s15 = scalar_lea.vmem %s1586_s26, 16  ;;  %p1017_p3 = scmp.lt.s32.totalorder %s1586_s26, %s1614_s28 }
  0x59   : > { %p1011_p11 = scmp.ne.s32.totalorder %s1586_s26, %s1010_s15  ;;  %p1018_p4 = scmp.lt.s32.totalorder %s1617_s4, %s1010_s15 }
  0x5b   : > { %p1012_p1 = pnand %p1011_p11, %p1565_p13  ;;  %p1019_p5 = por %p1018_p4, %p1017_p3 }
  0x5d   : > { %p1013_p2 = pneg %p1012_p1 }
  0x5f   : > { %p1020_p12 = pnand %p1019_p5, %p1013_p2 }
  0x61   : > { %1023 = shalt.err (!%p1020_p12)  }
  0x62   : > { %798 = dma.hbm_to_vmem [thread:$0]  (%p1565_p13), %s179_s17, 16, %s1586_s26, [#allocation2] }
  0x63   : > { %s2233_s25 = sadd.s32 2, %s1551_s30  ;;  %s213_s7 = sadd.s32 3, %s1548_s27 }
  0x64   : > { %s2294_s25 = smov (!%p1588_p0, %s2233_s25), 0  ;;  %p1655_p6 = scmp.lt.s32.totalorder %s213_s7, 24 }
  0x65   : > { %s198_s8 = sld [smem:[%s800_s5 + %s2294_s25]]  ;;  %s218_s10 = sadd.s32 3, %s1551_s30 }
  0x66   : > { %s2234_s9 = scalar_select %p1655_p6, 1, 0 }
  0x67   : > { %s222_s13 = scalar_lea.vmem %s1563_s11, 3  ;;  %s234_s16 = sadd.s32 4, %s1548_s27 }
  0x68   : > { %s804_s26 = scalar_select %p1655_p6, [#allocation4], [#allocation42] }
  0x69   : > { %s2296_s10 = smov (!%p1655_p6, %s218_s10), 0  ;;  %s230_s17 = sshll.u32 %s222_s13, 4  ;;  %s1671_s17 = int_to_ptr.vmem [resolvable:$true] %s230_s17 }
  0x6a   : > { %s1666_s24 = sld [smem:[%s804_s26 + %s2296_s10]] }
  0x6b   : > { %s744_s23 = sshll.u32 %s198_s8, 4 }
  0x6c   : > { %s200_s25 = scalar_lea.hbm %s2177_s2, %s744_s23 }
  0x6d   : > { %s1024_s7 = scalar_lea.hbm %s200_s25, 16  ;;  %p1029_p9 = scmp.lt.s32.totalorder %s200_s25, %s2177_s2 }
  0x6e   : > { %p1025_p12 = scmp.ne.s32.totalorder %s200_s25, %s1024_s7  ;;  %p1030_p10 = scmp.lt.s32.totalorder %s1601_s14, %s1024_s7 }
  0x70   : > { %p1026_p7 = pnand %p1025_p12, %p1588_p0  ;;  %p1031_p11 = por %p1030_p10, %p1029_p9 }
  0x72   : > { %p1027_p8 = pneg %p1026_p7 }
  0x74   : > { %p1032_p1 = pnand %p1031_p11, %p1027_p8 }
  0x76   : > { %1035 = shalt.err (!%p1032_p1)  }
  0x77   : > { %s1036_s8 = scalar_lea.vmem %s1652_s18, 16  ;;  %p1043_p5 = scmp.lt.s32.totalorder %s1652_s18, %s1614_s28 }
  0x78   : > { %p1037_p2 = scmp.ne.s32.totalorder %s1652_s18, %s1036_s8  ;;  %p1044_p12 = scmp.lt.s32.totalorder %s1617_s4, %s1036_s8 }
  0x7a   : > { %p1038_p3 = pnand %p1037_p2, %p1588_p0  ;;  %p1045_p7 = por %p1044_p12, %p1043_p5 }
  0x7c   : > { %p1039_p4 = pneg %p1038_p3 }
  0x7e   : > { %p1046_p13 = pnand %p1045_p7, %p1039_p4 }
  0x80   : > { %1049 = shalt.err (!%p1046_p13)  }
  0x81   : > { %802 = dma.hbm_to_vmem [thread:$0]  (%p1588_p0), %s200_s25, 16, %s1652_s18, [#allocation2] }
  0x82   : > { %p1689_p8 = scmp.lt.s32.totalorder %s234_s16, 24  ;;  %s239_s3 = sadd.s32 4, %s1551_s30 }
  0x83   : > { %s243_s10 = scalar_lea.vmem %s1563_s11, 4  ;;  %s255_s13 = sadd.s32 5, %s1548_s27 }
  0x84   : > { %s2235_s1 = scalar_select %p1689_p8, 1, 0 }
  0x85   : > { %s808_s26 = scalar_select %p1689_p8, [#allocation4], [#allocation43] }
  0x86   : > { %s746_s23 = sshll.u32 %s1666_s24, 4  ;;  %s251_s15 = sshll.u32 %s243_s10, 4  ;;  %s1702_s15 = int_to_ptr.vmem [resolvable:$true] %s251_s15 }
  0x87   : > { %s221_s8 = scalar_lea.hbm %s2177_s2, %s746_s23 }
  0x88   : > { %s1050_s22 = scalar_lea.hbm %s221_s8, 16  ;;  %p1055_p11 = scmp.lt.s32.totalorder %s221_s8, %s2177_s2 }
  0x89   : > { %p1051_p13 = scmp.ne.s32.totalorder %s221_s8, %s1050_s22  ;;  %p1056_p1 = scmp.lt.s32.totalorder %s1601_s14, %s1050_s22 }
  0x8b   : > { %p1052_p9 = pnand %p1051_p13, %p1655_p6  ;;  %p1057_p2 = por %p1056_p1, %p1055_p11 }
  0x8d   : > { %p1053_p10 = pneg %p1052_p9 }
  0x8f   : > { %p1058_p3 = pnand %p1057_p2, %p1053_p10 }
  0x91   : > { %1061 = shalt.err (!%p1058_p3)  }
  0x92   : > { %s1062_s24 = scalar_lea.vmem %s1671_s17, 16  ;;  %p1069_p7 = scmp.lt.s32.totalorder %s1671_s17, %s1614_s28 }
  0x93   : > { %p1063_p4 = scmp.ne.s32.totalorder %s1671_s17, %s1062_s24  ;;  %p1070_p13 = scmp.lt.s32.totalorder %s1617_s4, %s1062_s24 }
  0x95   : > { %p1064_p5 = pnand %p1063_p4, %p1655_p6  ;;  %p1071_p9 = por %p1070_p13, %p1069_p7 }
  0x97   : > { %p1065_p12 = pneg %p1064_p5 }
  0x99   : > { %p1072_p0 = pnand %p1071_p9, %p1065_p12 }
  0x9b   : > { %1075 = shalt.err (!%p1072_p0)  }
  0x9c   : > { %806 = dma.hbm_to_vmem [thread:$0]  (%p1655_p6), %s221_s8, 16, %s1671_s17, [#allocation2] }
  0x9d   : > { %s2298_s3 = smov (!%p1689_p8, %s239_s3), 0  ;;  %p1722_p10 = scmp.lt.s32.totalorder %s255_s13, 24 }
  0x9e   : > { %s240_s25 = sld [smem:[%s808_s26 + %s2298_s3]]  ;;  %s260_s10 = sadd.s32 5, %s1551_s30 }
  0x9f   : > { %s2236_s22 = scalar_select %p1722_p10, 1, 0 }
  0xa0   : > { %s812_s23 = scalar_select %p1722_p10, [#allocation4], [#allocation44] }
  0xa1   : > { %s2300_s10 = smov (!%p1722_p10, %s260_s10), 0  ;;  %s264_s5 = scalar_lea.vmem %s1563_s11, 5 }
  0xa2   : > { %s276_s7 = sadd.s32 6, %s1548_s27  ;;  %s1733_s18 = sld [smem:[%s812_s23 + %s2300_s10]] }
  0xa3   : > { %s272_s17 = sshll.u32 %s264_s5, 4  ;;  %p1737_p0 = scmp.lt.s32.totalorder %s276_s7, 24  ;;  %s1735_s17 = int_to_ptr.vmem [resolvable:$true] %s272_s17 }
  0xa4   : > { %s748_s13 = sshll.u32 %s240_s25, 4 }
  0xa5   : > { %s2237_s8 = scalar_select %p1737_p0, 1, 0 }
  0xa6   : > { %s242_s26 = scalar_lea.hbm %s2177_s2, %s748_s13 }
  0xa7   : > { %s1076_s21 = scalar_lea.hbm %s242_s26, 16  ;;  %p1081_p3 = scmp.lt.s32.totalorder %s242_s26, %s2177_s2 }
  0xa8   : > { %p1077_p11 = scmp.ne.s32.totalorder %s242_s26, %s1076_s21  ;;  %p1082_p4 = scmp.lt.s32.totalorder %s1601_s14, %s1076_s21 }
  0xaa   : > { %p1078_p1 = pnand %p1077_p11, %p1689_p8  ;;  %p1083_p5 = por %p1082_p4, %p1081_p3 }
  0xac   : > { %p1079_p2 = pneg %p1078_p1 }
  0xae   : > { %p1084_p12 = pnand %p1083_p5, %p1079_p2 }
  0xb0   : > { %1087 = shalt.err (!%p1084_p12)  }
  0xb1   : > { %s1088_s25 = scalar_lea.vmem %s1702_s15, 16  ;;  %p1095_p11 = scmp.lt.s32.totalorder %s1702_s15, %s1614_s28 }
  0xb2   : > { %p1089_p7 = scmp.ne.s32.totalorder %s1702_s15, %s1088_s25  ;;  %p1096_p1 = scmp.lt.s32.totalorder %s1617_s4, %s1088_s25 }
  0xb4   : > { %p1090_p13 = pnand %p1089_p7, %p1689_p8  ;;  %p1097_p6 = por %p1096_p1, %p1095_p11 }
  0xb6   : > { %p1091_p9 = pneg %p1090_p13 }
  0xb8   : > { %p1098_p10 = pnand %p1097_p6, %p1091_p9 }
  0xba   : > { %1101 = shalt.err (!%p1098_p10)  }
  0xbb   : > { %810 = dma.hbm_to_vmem [thread:$0]  (%p1689_p8), %s242_s26, 16, %s1702_s15, [#allocation2] }
  0xbc   : > { %s816_s21 = scalar_select %p1737_p0, [#allocation4], [#allocation45] }
  0xbd   : > { %s750_s5 = sshll.u32 %s1733_s18, 4  ;;  %s285_s7 = scalar_lea.vmem %s1563_s11, 6 }
  0xbe   : > { %s263_s3 = scalar_lea.hbm %s2177_s2, %s750_s5  ;;  %s293_s10 = sshll.u32 %s285_s7, 4  ;;  %s1788_s10 = int_to_ptr.vmem [resolvable:$true] %s293_s10 }
  0xbf   : > { %s1102_s23 = scalar_lea.hbm %s263_s3, 16  ;;  %p2238_p10 = scmp.ne.s32.totalorder %s2236_s22, 0 }
  0xc0   : > { %p1103_p6 = scmp.ne.s32.totalorder %s263_s3, %s1102_s23  ;;  %p1107_p4 = scmp.lt.s32.totalorder %s263_s3, %s2177_s2 }
  0xc1   : > { %p1108_p5 = scmp.lt.s32.totalorder %s1601_s14, %s1102_s23 }
  0xc2   : > { %p1104_p2 = pnand %p1103_p6, %p2238_p10 }
  0xc3   : > { %p1109_p12 = por %p1108_p5, %p1107_p4 }
  0xc4   : > { %p1105_p3 = pneg %p1104_p2 }
  0xc6   : > { %p1110_p7 = pnand %p1109_p12, %p1105_p3 }
  0xc8   : > { %1113 = shalt.err (!%p1110_p7)  }
  0xc9   : > { %s1114_s15 = scalar_lea.vmem %s1735_s17, 16  ;;  %p1121_p1 = scmp.lt.s32.totalorder %s1735_s17, %s1614_s28 }
  0xca   : > { %p1115_p13 = scmp.ne.s32.totalorder %s1735_s17, %s1114_s15  ;;  %p1122_p6 = scmp.lt.s32.totalorder %s1617_s4, %s1114_s15 }
  0xcc   : > { %p1116_p9 = pnand %p1115_p13, %p2238_p10  ;;  %p1123_p2 = por %p1122_p6, %p1121_p1 }
  0xce   : > { %p1117_p11 = pneg %p1116_p9 }
  0xd0   : > { %p1124_p8 = pnand %p1123_p2, %p1117_p11 }
  0xd2   : > { %1127 = shalt.err (!%p1124_p8)  }
  0xd3   : > { %814 = dma.hbm_to_vmem [thread:$0]  (%p2238_p10), %s263_s3, 16, %s1735_s17, [#allocation2] }
  0xd4   : > { %s2239_s18 = sadd.s32 6, %s1551_s30  ;;  %s297_s26 = sadd.s32 7, %s1548_s27 }
  0xd5   : > { %s2302_s18 = smov (!%p1737_p0, %s2239_s18), 0  ;;  %p1791_p3 = scmp.lt.s32.totalorder %s297_s26, 24 }
  0xd6   : > { %s282_s24 = sld [smem:[%s816_s21 + %s2302_s18]]  ;;  %s302_s7 = sadd.s32 7, %s1551_s30 }
  0xd7   : > { %s2240_s5 = scalar_select %p1791_p3, 1, 0 }
  0xd8   : > { %s306_s13 = scalar_lea.vmem %s1563_s11, 7  ;;  %s318_s16 = sadd.s32 8, %s1548_s27 }
  0xd9   : > { %s820_s17 = scalar_select %p1791_p3, [#allocation4], [#allocation46] }
  0xda   : > { %s2304_s7 = smov (!%p1791_p3, %s302_s7), 0  ;;  %s314_s3 = sshll.u32 %s306_s13, 4  ;;  %s1807_s3 = int_to_ptr.vmem [resolvable:$true] %s314_s3 }
  0xdb   : > { %s1802_s25 = sld [smem:[%s820_s17 + %s2304_s7]] }
  0xdc   : > { %s752_s23 = sshll.u32 %s282_s24, 4 }
  0xdd   : > { %s284_s18 = scalar_lea.hbm %s2177_s2, %s752_s23 }
  0xde   : > { %s1128_s26 = scalar_lea.hbm %s284_s18, 16  ;;  %p1133_p12 = scmp.lt.s32.totalorder %s284_s18, %s2177_s2 }
  0xdf   : > { %p1129_p8 = scmp.ne.s32.totalorder %s284_s18, %s1128_s26  ;;  %p1134_p7 = scmp.lt.s32.totalorder %s1601_s14, %s1128_s26 }
  0xe1   : > { %p1130_p4 = pnand %p1129_p8, %p1737_p0  ;;  %p1135_p13 = por %p1134_p7, %p1133_p12 }
  0xe3   : > { %p1131_p5 = pneg %p1130_p4 }
  0xe5   : > { %p1136_p9 = pnand %p1135_p13, %p1131_p5 }
  0xe7   : > { %1139 = shalt.err (!%p1136_p9)  }
  0xe8   : > { %s1140_s24 = scalar_lea.vmem %s1788_s10, 16  ;;  %p1147_p2 = scmp.lt.s32.totalorder %s1788_s10, %s1614_s28 }
  0xe9   : > { %p1141_p11 = scmp.ne.s32.totalorder %s1788_s10, %s1140_s24  ;;  %p1148_p8 = scmp.lt.s32.totalorder %s1617_s4, %s1140_s24 }
  0xeb   : > { %p1142_p1 = pnand %p1141_p11, %p1737_p0  ;;  %p1149_p4 = por %p1148_p8, %p1147_p2 }
  0xed   : > { %p1143_p6 = pneg %p1142_p1 }
  0xef   : > { %p1150_p10 = pnand %p1149_p4, %p1143_p6 }
  0xf1   : > { %1153 = shalt.err (!%p1150_p10)  }
  0xf2   : > { %818 = dma.hbm_to_vmem [thread:$0]  (%p1737_p0), %s284_s18, 16, %s1788_s10, [#allocation2] }
  0xf3   : > { %p1825_p5 = scmp.lt.s32.totalorder %s318_s16, 24  ;;  %s323_s0 = sadd.s32 8, %s1551_s30 }
  0xf4   : > { %s327_s7 = scalar_lea.vmem %s1563_s11, 8  ;;  %s340_s13 = sadd.s32 9, %s1548_s27 }
  0xf5   : > { %s2241_s19 = scalar_select %p1825_p5, 1, 0 }
  0xf6   : > { %s824_s17 = scalar_select %p1825_p5, [#allocation4], [#allocation47] }
  0xf7   : > { %2242 = sst [smem:[#allocation78_spill]] %s2241_s19  ;;  %s754_s23 = sshll.u32 %s1802_s25, 4 }
  0xf8   : > { %s336_s15 = sshll.u32 %s327_s7, 4  ;;  %s305_s24 = scalar_lea.hbm %s2177_s2, %s754_s23  ;;  %s1838_s15 = int_to_ptr.vmem [resolvable:$true] %s336_s15 }
  0xf9   : > { %s1154_s20 = scalar_lea.hbm %s305_s24, 16  ;;  %p1159_p13 = scmp.lt.s32.totalorder %s305_s24, %s2177_s2 }
  0xfa   : > { %p1155_p10 = scmp.ne.s32.totalorder %s305_s24, %s1154_s20  ;;  %p1160_p9 = scmp.lt.s32.totalorder %s1601_s14, %s1154_s20 }
  0xfc   : > { %p1156_p12 = pnand %p1155_p10, %p1791_p3  ;;  %p1161_p11 = por %p1160_p9, %p1159_p13 }
  0xfe   : > { %p1157_p7 = pneg %p1156_p12 }
 0x100   : > { %p1162_p1 = pnand %p1161_p11, %p1157_p7 }
 0x102   : > { %1165 = shalt.err (!%p1162_p1)  }
 0x103   : > { %s1166_s25 = scalar_lea.vmem %s1807_s3, 16  ;;  %p1173_p4 = scmp.lt.s32.totalorder %s1807_s3, %s1614_s28 }
 0x104   : > { %p1167_p6 = scmp.ne.s32.totalorder %s1807_s3, %s1166_s25  ;;  %p1174_p10 = scmp.lt.s32.totalorder %s1617_s4, %s1166_s25 }
 0x106   : > { %p1168_p2 = pnand %p1167_p6, %p1791_p3  ;;  %p1175_p12 = por %p1174_p10, %p1173_p4 }
 0x108   : > { %p1169_p8 = pneg %p1168_p2 }
 0x10a   : > { %p1176_p0 = pnand %p1175_p12, %p1169_p8 }
 0x10c   : > { %1179 = shalt.err (!%p1176_p0)  }
 0x10d   : > { %822 = dma.hbm_to_vmem [thread:$0]  (%p1791_p3), %s305_s24, 16, %s1807_s3, [#allocation2] }
 0x10e   : > { %s2306_s0 = smov (!%p1825_p5, %s323_s0), 0  ;;  %p1858_p7 = scmp.lt.s32.totalorder %s340_s13, 24 }
 0x10f   : > { %s324_s18 = sld [smem:[%s824_s17 + %s2306_s0]]  ;;  %s345_s7 = sadd.s32 9, %s1551_s30 }
 0x110   : > { %s2243_s20 = scalar_select %p1858_p7, 1, 0 }
 0x111   : > { %s828_s23 = scalar_select %p1858_p7, [#allocation4], [#allocation48] }
 0x112   : > { %2244 = sst [smem:[#allocation79_spill]] %s2243_s20  ;;  %s2308_s7 = smov (!%p1858_p7, %s345_s7), 0 }
 0x113   : > { %s349_s21 = scalar_lea.vmem %s1563_s11, 9  ;;  %s362_s26 = sadd.s32 10, %s1548_s27 }
 0x114   : > { %s1869_s10 = sld [smem:[%s828_s23 + %s2308_s7]]  ;;  %s358_s3 = sshll.u32 %s349_s21, 4  ;;  %s1871_s3 = int_to_ptr.vmem [resolvable:$true] %s358_s3 }
 0x115   : > { %s756_s13 = sshll.u32 %s324_s18, 4  ;;  %p1873_p0 = scmp.lt.s32.totalorder %s362_s26, 24 }
 0x116   : > { %s326_s17 = scalar_lea.hbm %s2177_s2, %s756_s13 }
 0x117   : > { %s2245_s24 = scalar_select %p1873_p0, 1, 0 }
 0x118   : > { %s1180_s6 = scalar_lea.hbm %s326_s17, 16  ;;  %p1185_p1 = scmp.lt.s32.totalorder %s326_s17, %s2177_s2 }
 0x119   : > { %2246 = sst [smem:[#allocation80_spill]] %s2245_s24  ;;  %p1181_p13 = scmp.ne.s32.totalorder %s326_s17, %s1180_s6 }
 0x11a   : > { %p1186_p6 = scmp.lt.s32.totalorder %s1601_s14, %s1180_s6 }
 0x11b   : > { %p1182_p9 = pnand %p1181_p13, %p1825_p5 }
 0x11c   : > { %p1187_p2 = por %p1186_p6, %p1185_p1 }
 0x11d   : > { %p1183_p11 = pneg %p1182_p9 }
 0x11f   : > { %p1188_p8 = pnand %p1187_p2, %p1183_p11 }
 0x121   : > { %1191 = shalt.err (!%p1188_p8)  }
 0x122   : > { %s1192_s18 = scalar_lea.vmem %s1838_s15, 16  ;;  %p1199_p13 = scmp.lt.s32.totalorder %s1838_s15, %s1614_s28 }
 0x123   : > { %p1193_p4 = scmp.ne.s32.totalorder %s1838_s15, %s1192_s18  ;;  %p1200_p9 = scmp.lt.s32.totalorder %s1617_s4, %s1192_s18 }
 0x125   : > { %p1194_p10 = pnand %p1193_p4, %p1825_p5  ;;  %p1201_p3 = por %p1200_p9, %p1199_p13 }
 0x127   : > { %p1195_p12 = pneg %p1194_p10 }
 0x129   : > { %p1202_p7 = pnand %p1201_p3, %p1195_p12 }
 0x12b   : > { %1205 = shalt.err (!%p1202_p7)  }
 0x12c   : > { %826 = dma.hbm_to_vmem [thread:$0]  (%p1825_p5), %s326_s17, 16, %s1838_s15, [#allocation2 + $0x1] }
 0x12d   : > { %s832_s6 = scalar_select %p1873_p0, [#allocation4], [#allocation49] }
 0x12e   : > { %s758_s21 = sshll.u32 %s1869_s10, 4  ;;  %s371_s26 = scalar_lea.vmem %s1563_s11, 10 }
 0x12f   : > { %s348_s0 = scalar_lea.hbm %s2177_s2, %s758_s21  ;;  %s380_s7 = sshll.u32 %s371_s26, 4  ;;  %s1924_s7 = int_to_ptr.vmem [resolvable:$true] %s380_s7 }
 0x130   : > { %s1206_s23 = scalar_lea.hbm %s348_s0, 16  ;;  %p2247_p7 = scmp.ne.s32.totalorder %s2243_s20, 0 }
 0x131   : > { %p1207_p3 = scmp.ne.s32.totalorder %s348_s0, %s1206_s23  ;;  %p1211_p6 = scmp.lt.s32.totalorder %s348_s0, %s2177_s2 }
 0x132   : > { %p1212_p2 = scmp.lt.s32.totalorder %s1601_s14, %s1206_s23 }
 0x133   : > { %p1208_p11 = pnand %p1207_p3, %p2247_p7 }
 0x134   : > { %p1213_p8 = por %p1212_p2, %p1211_p6 }
 0x135   : > { %p1209_p1 = pneg %p1208_p11 }
 0x137   : > { %p1214_p4 = pnand %p1213_p8, %p1209_p1 }
 0x139   : > { %1217 = shalt.err (!%p1214_p4)  }
 0x13a   : > { %s1218_s15 = scalar_lea.vmem %s1871_s3, 16  ;;  %p1225_p9 = scmp.lt.s32.totalorder %s1871_s3, %s1614_s28 }
 0x13b   : > { %p1219_p10 = scmp.ne.s32.totalorder %s1871_s3, %s1218_s15  ;;  %p1226_p3 = scmp.lt.s32.totalorder %s1617_s4, %s1218_s15 }
 0x13d   : > { %p1220_p12 = pnand %p1219_p10, %p2247_p7  ;;  %p1227_p11 = por %p1226_p3, %p1225_p9 }
 0x13f   : > { %p1221_p13 = pneg %p1220_p12 }
 0x141   : > { %p1228_p5 = pnand %p1227_p11, %p1221_p13 }
 0x143   : > { %1231 = shalt.err (!%p1228_p5)  }
 0x144   : > { %830 = dma.hbm_to_vmem [thread:$0]  (%p2247_p7), %s348_s0, 16, %s1871_s3, [#allocation2 + $0x1] }
 0x145   : > { %s2248_s10 = sadd.s32 10, %s1551_s30  ;;  %s384_s17 = sadd.s32 11, %s1548_s27 }
 0x146   : > { %s2310_s10 = smov (!%p1873_p0, %s2248_s10), 0  ;;  %p1927_p5 = scmp.lt.s32.totalorder %s384_s17, 24 }
 0x147   : > { %s368_s25 = sld [smem:[%s832_s6 + %s2310_s10]]  ;;  %s389_s26 = sadd.s32 11, %s1551_s30 }
 0x148   : > { %s2249_s21 = scalar_select %p1927_p5, 1, 0 }
 0x149   : > { %s393_s13 = scalar_lea.vmem %s1563_s11, 11  ;;  %s406_s16 = sadd.s32 12, %s1548_s27 }
 0x14a   : > { %s836_s3 = scalar_select %p1927_p5, [#allocation4], [#allocation50] }
 0x14b   : > { %s2312_s26 = smov (!%p1927_p5, %s389_s26), 0  ;;  %s402_s0 = sshll.u32 %s393_s13, 4  ;;  %s403_s0 = int_to_ptr.vmem [resolvable:$true] %s402_s0 }
 0x14c   : > { %s1938_s18 = sld [smem:[%s836_s3 + %s2312_s26]] }
 0x14d   : > { %s760_s23 = sshll.u32 %s368_s25, 4 }
 0x14e   : > { %s370_s10 = scalar_lea.hbm %s2177_s2, %s760_s23 }
 0x14f   : > { %s1232_s17 = scalar_lea.hbm %s370_s10, 16  ;;  %p1237_p8 = scmp.lt.s32.totalorder %s370_s10, %s2177_s2 }
 0x150   : > { %p1233_p1 = scmp.ne.s32.totalorder %s370_s10, %s1232_s17  ;;  %p1238_p4 = scmp.lt.s32.totalorder %s1601_s14, %s1232_s17 }
 0x152   : > { %p1234_p6 = pnand %p1233_p1, %p1873_p0  ;;  %p1239_p10 = por %p1238_p4, %p1237_p8 }
 0x154   : > { %p1235_p2 = pneg %p1234_p6 }
 0x156   : > { %p1240_p12 = pnand %p1239_p10, %p1235_p2 }
 0x158   : > { %1243 = shalt.err (!%p1240_p12)  }
 0x159   : > { %s1244_s25 = scalar_lea.vmem %s1924_s7, 16  ;;  %p1251_p11 = scmp.lt.s32.totalorder %s1924_s7, %s1614_s28 }
 0x15a   : > { %p1245_p13 = scmp.ne.s32.totalorder %s1924_s7, %s1244_s25  ;;  %p1252_p1 = scmp.lt.s32.totalorder %s1617_s4, %s1244_s25 }
 0x15c   : > { %p1246_p9 = pnand %p1245_p13, %p1873_p0  ;;  %p1253_p6 = por %p1252_p1, %p1251_p11 }
 0x15e   : > { %p1247_p3 = pneg %p1246_p9 }
 0x160   : > { %p1254_p7 = pnand %p1253_p6, %p1247_p3 }
 0x162   : > { %1257 = shalt.err (!%p1254_p7)  }
 0x163   : > { %834 = dma.hbm_to_vmem [thread:$0]  (%p1873_p0), %s370_s10, 16, %s1924_s7, [#allocation2 + $0x1] }
 0x164   : > { %p1959_p2 = scmp.lt.s32.totalorder %s406_s16, 24  ;;  %s411_s20 = sadd.s32 12, %s1551_s30 }
 0x165   : > { %s415_s26 = scalar_lea.vmem %s1563_s11, 12  ;;  %s762_s3 = sshll.u32 %s1938_s18, 4 }
 0x166   : > { %s2250_s19 = scalar_select %p1959_p2, 1, 0 }
 0x167   : > { %s840_s13 = scalar_select %p1959_p2, [#allocation4], [#allocation51] }
 0x168   : > { %s428_s23 = sadd.s32 13, %s1548_s27  ;;  %s392_s17 = scalar_lea.hbm %s2177_s2, %s762_s3 }
 0x169   : > { %s1972_s25 = sshll.u32 %s415_s26, 4  ;;  %s1258_s24 = scalar_lea.hbm %s392_s17, 16  ;;  %s425_s25 = int_to_ptr.vmem [resolvable:$true] %s1972_s25 }
 0x16a   : > { %p1259_p7 = scmp.ne.s32.totalorder %s392_s17, %s1258_s24  ;;  %p1263_p10 = scmp.lt.s32.totalorder %s392_s17, %s2177_s2 }
 0x16b   : > { %p1264_p12 = scmp.lt.s32.totalorder %s1601_s14, %s1258_s24 }
 0x16c   : > { %p1260_p8 = pnand %p1259_p7, %p1927_p5 }
 0x16d   : > { %p1265_p13 = por %p1264_p12, %p1263_p10 }
 0x16e   : > { %p1261_p4 = pneg %p1260_p8 }
 0x170   : > { %p1266_p9 = pnand %p1265_p13, %p1261_p4 }
 0x172   : > { %1269 = shalt.err (!%p1266_p9)  }
 0x173   : > { %s1270_s18 = scalar_lea.vmem %s403_s0, 16  ;;  %p1277_p6 = scmp.lt.s32.totalorder %s403_s0, %s1614_s28 }
 0x174   : > { %p1271_p3 = scmp.ne.s32.totalorder %s403_s0, %s1270_s18  ;;  %p1278_p0 = scmp.lt.s32.totalorder %s1617_s4, %s1270_s18 }
 0x176   : > { %p1272_p11 = pnand %p1271_p3, %p1927_p5  ;;  %p1279_p7 = por %p1278_p0, %p1277_p6 }
 0x178   : > { %p1273_p1 = pneg %p1272_p11 }
 0x17a   : > { %p1280_p8 = pnand %p1279_p7, %p1273_p1 }
 0x17c   : > { %1283 = shalt.err (!%p1280_p8)  }
 0x17d   : > { %838 = dma.hbm_to_vmem [thread:$0]  (%p1927_p5), %s392_s17, 16, %s403_s0, [#allocation2 + $0x1] }
 0x17e   : > { %s2314_s20 = smov (!%p1959_p2, %s411_s20), 0  ;;  %p1988_p4 = scmp.lt.s32.totalorder %s428_s23, 24 }
 0x17f   : > { %s412_s10 = sld [smem:[%s840_s13 + %s2314_s20]]  ;;  %s433_s26 = sadd.s32 13, %s1551_s30 }
 0x180   : > { %s2251_s24 = scalar_select %p1988_p4, 1, 0 }
 0x181   : > { %s844_s3 = scalar_select %p1988_p4, [#allocation4], [#allocation52] }
 0x182   : > { %2252 = sst [smem:[#allocation81_spill]] %s2251_s24  ;;  %s2316_s26 = smov (!%p1988_p4, %s433_s26), 0 }
 0x183   : > { %s437_s15 = scalar_lea.vmem %s1563_s11, 13  ;;  %s450_s6 = sadd.s32 14, %s1548_s27 }
 0x184   : > { %s1999_s7 = sld [smem:[%s844_s3 + %s2316_s26]]  ;;  %s446_s0 = sshll.u32 %s437_s15, 4  ;;  %s2009_s0 = int_to_ptr.vmem [resolvable:$true] %s446_s0 }
 0x185   : > { %s764_s23 = sshll.u32 %s412_s10, 4  ;;  %p2002_p0 = scmp.lt.s32.totalorder %s450_s6, 24 }
 0x186   : > { %s414_s20 = scalar_lea.hbm %s2177_s2, %s764_s23 }
 0x187   : > { %s1284_s13 = scalar_lea.hbm %s414_s20, 16  ;;  %p1289_p9 = scmp.lt.s32.totalorder %s414_s20, %s2177_s2 }
 0x188   : > { %p1285_p10 = scmp.ne.s32.totalorder %s414_s20, %s1284_s13  ;;  %p1290_p3 = scmp.lt.s32.totalorder %s1601_s14, %s1284_s13 }
 0x18a   : > { %p1286_p12 = pnand %p1285_p10, %p1959_p2  ;;  %p1291_p11 = por %p1290_p3, %p1289_p9 }
 0x18c   : > { %p1287_p13 = pneg %p1286_p12 }
 0x18e   : > { %p1292_p1 = pnand %p1291_p11, %p1287_p13 }
 0x190   : > { %1295 = shalt.err (!%p1292_p1)  }
 0x191   : > { %s1296_s10 = scalar_lea.vmem %s425_s25, 16  ;;  %p1303_p5 = scmp.lt.s32.totalorder %s425_s25, %s1614_s28 }
 0x192   : > { %p1297_p6 = scmp.ne.s32.totalorder %s425_s25, %s1296_s10  ;;  %p1304_p4 = scmp.lt.s32.totalorder %s1617_s4, %s1296_s10 }
 0x194   : > { %p1298_p7 = pnand %p1297_p6, %p1959_p2  ;;  %p1305_p10 = por %p1304_p4, %p1303_p5 }
 0x196   : > { %p1299_p8 = pneg %p1298_p7 }
 0x198   : > { %p1306_p12 = pnand %p1305_p10, %p1299_p8 }
 0x19a   : > { %1309 = shalt.err (!%p1306_p12)  }
 0x19b   : > { %842 = dma.hbm_to_vmem [thread:$0]  (%p1959_p2), %s414_s20, 16, %s425_s25, [#allocation2 + $0x1] }
 0x19c   : > { %s848_s15 = scalar_select %p2002_p0, [#allocation4], [#allocation53] }
 0x19d   : > { %s766_s6 = sshll.u32 %s1999_s7, 4  ;;  %s455_s23 = sadd.s32 14, %s1551_s30 }
 0x19e   : > { %s436_s13 = scalar_lea.hbm %s2177_s2, %s766_s6  ;;  %p2254_p4 = scmp.ne.s32.totalorder %s2251_s24, 0 }
 0x19f   : > { %s1310_s26 = scalar_lea.hbm %s436_s13, 16  ;;  %p1315_p3 = scmp.lt.s32.totalorder %s436_s13, %s2177_s2 }
 0x1a0   : > { %p1311_p5 = scmp.ne.s32.totalorder %s436_s13, %s1310_s26  ;;  %p1316_p11 = scmp.lt.s32.totalorder %s1601_s14, %s1310_s26 }
 0x1a2   : > { %p1312_p13 = pnand %p1311_p5, %p2254_p4  ;;  %p1317_p1 = por %p1316_p11, %p1315_p3 }
 0x1a4   : > { %p1313_p9 = pneg %p1312_p13 }
 0x1a6   : > { %p1318_p6 = pnand %p1317_p1, %p1313_p9 }
 0x1a8   : > { %1321 = shalt.err (!%p1318_p6)  }
 0x1a9   : > { %s1322_s25 = scalar_lea.vmem %s2009_s0, 16  ;;  %p1329_p12 = scmp.lt.s32.totalorder %s2009_s0, %s1614_s28 }
 0x1aa   : > { %p1323_p7 = scmp.ne.s32.totalorder %s2009_s0, %s1322_s25  ;;  %p1330_p5 = scmp.lt.s32.totalorder %s1617_s4, %s1322_s25 }
 0x1ac   : > { %p1324_p8 = pnand %p1323_p7, %p2254_p4  ;;  %p1331_p13 = por %p1330_p5, %p1329_p12 }
 0x1ae   : > { %p1325_p10 = pneg %p1324_p8 }
 0x1b0   : > { %p1332_p2 = pnand %p1331_p13, %p1325_p10 }
 0x1b2   : > { %1335 = shalt.err (!%p1332_p2)  }
 0x1b3   : > { %846 = dma.hbm_to_vmem [thread:$0]  (%p2254_p4), %s436_s13, 16, %s2009_s0, [#allocation2 + $0x1] }
 0x1b4   : > { %s2318_s23 = smov (!%p2002_p0, %s455_s23), 0  ;;  %s459_s7 = scalar_lea.vmem %s1563_s11, 14 }
 0x1b5   : > { %s472_s20 = sadd.s32 15, %s1548_s27  ;;  %s456_s6 = sld [smem:[%s848_s15 + %s2318_s23]] }
 0x1b6   : > { %p2050_p9 = scmp.lt.s32.totalorder %s472_s20, 24  ;;  %s477_s18 = sadd.s32 15, %s1551_s30 }
 0x1b7   : > { %s468_s26 = sshll.u32 %s459_s7, 4  ;;  %s481_s3 = scalar_lea.vmem %s1563_s11, 15  ;;  %s469_s26 = int_to_ptr.vmem [resolvable:$true] %s468_s26 }
 0x1b8   : > { %s852_s10 = scalar_select %p2050_p9, [#allocation4], [#allocation54] }
 0x1b9   : > { %s2320_s18 = smov (!%p2050_p9, %s477_s18), 0  ;;  %s490_s23 = sshll.u32 %s481_s3, 4  ;;  %s491_s23 = int_to_ptr.vmem [resolvable:$true] %s490_s23 }
 0x1ba   : > { %s478_s13 = sld [smem:[%s852_s10 + %s2320_s18]] }
 0x1bb   : > { %s768_s0 = sshll.u32 %s456_s6, 4 }
 0x1bc   : > { %s458_s15 = scalar_lea.hbm %s2177_s2, %s768_s0 }
 0x1bd   : > { %s1336_s20 = scalar_lea.hbm %s458_s15, 16  ;;  %p1341_p1 = scmp.lt.s32.totalorder %s458_s15, %s2177_s2 }
 0x1be   : > { %p1337_p2 = scmp.ne.s32.totalorder %s458_s15, %s1336_s20  ;;  %p1342_p6 = scmp.lt.s32.totalorder %s1601_s14, %s1336_s20 }
 0x1c0   : > { %p1338_p3 = pnand %p1337_p2, %p2002_p0  ;;  %p1343_p7 = por %p1342_p6, %p1341_p1 }
 0x1c2   : > { %p1339_p11 = pneg %p1338_p3 }
 0x1c4   : > { %p1344_p8 = pnand %p1343_p7, %p1339_p11 }
 0x1c6   : > { %1347 = shalt.err (!%p1344_p8)  }
 0x1c7   : > { %s1348_s6 = scalar_lea.vmem %s469_s26, 16  ;;  %p1355_p13 = scmp.lt.s32.totalorder %s469_s26, %s1614_s28 }
 0x1c8   : > { %p1349_p10 = scmp.ne.s32.totalorder %s469_s26, %s1348_s6  ;;  %p1356_p4 = scmp.lt.s32.totalorder %s1617_s4, %s1348_s6 }
 0x1ca   : > { %p1350_p12 = pnand %p1349_p10, %p2002_p0  ;;  %p1357_p2 = por %p1356_p4, %p1355_p13 }
 0x1cc   : > { %p1351_p5 = pneg %p1350_p12 }
 0x1ce   : > { %p1358_p3 = pnand %p1357_p2, %p1351_p5 }
 0x1d0   : > { %1361 = shalt.err (!%p1358_p3)  }
 0x1d1   : > { %850 = dma.hbm_to_vmem [thread:$0]  (%p2002_p0), %s458_s15, 16, %s469_s26, [#allocation2 + $0x1] }
 0x1d2   : > { %s770_s24 = sshll.u32 %s478_s13, 4 }
 0x1d3   : > { %s480_s10 = scalar_lea.hbm %s2177_s2, %s770_s24 }
 0x1d4   : > { %s1362_s0 = scalar_lea.hbm %s480_s10, 16  ;;  %p1367_p4 = scmp.lt.s32.totalorder %s480_s10, %s2177_s2 }
 0x1d5   : > { %p1363_p11 = scmp.ne.s32.totalorder %s480_s10, %s1362_s0  ;;  %p1368_p7 = scmp.lt.s32.totalorder %s1601_s14, %s1362_s0 }
 0x1d7   : > { %p1364_p1 = pnand %p1363_p11, %p2050_p9  ;;  %p1369_p8 = por %p1368_p7, %p1367_p4 }
 0x1d9   : > { %p1365_p6 = pneg %p1364_p1 }
 0x1db   : > { %p1370_p10 = pnand %p1369_p8, %p1365_p6 }
 0x1dd   : > { %1373 = shalt.err (!%p1370_p10)  }
 0x1de   : > { %s1374_s26 = scalar_lea.vmem %s491_s23, 16  ;;  %p1381_p2 = scmp.lt.s32.totalorder %s491_s23, %s1614_s28 }
 0x1df   : > { %p1375_p12 = scmp.ne.s32.totalorder %s491_s23, %s1374_s26  ;;  %p1382_p3 = scmp.lt.s32.totalorder %s1617_s4, %s1374_s26 }
 0x1e1   : > { %p1376_p5 = pnand %p1375_p12, %p2050_p9  ;;  %p1383_p11 = por %p1382_p3, %p1381_p2 }
 0x1e3   : > { %p1377_p13 = pneg %p1376_p5 }
 0x1e5   : > { %p1384_p1 = pnand %p1383_p11, %p1377_p13 }
 0x1e7   : > { %1387 = shalt.err (!%p1384_p1)  }
 0x1e8   : > { %854 = dma.hbm_to_vmem [thread:$0]  (%p2050_p9), %s480_s10, 16, %s491_s23, [#allocation2 + $0x1] }
 0x1e9   : > { %p2256_p4 = scmp.lt.s32.totalorder %s1548_s27, 24 }
 0x1eb   : > { %1411 = dma.done.wait (%p2256_p4), [#allocation2], 16  ;;  %p2257_p6 = pmov %p2256_p4 }
 0x1ec   : > { %p2258_p7 = scmp.ne.s32.totalorder %s2231_s12, 0 }
 0x1ed   : > { %1413 = vsyncadd (%p2257_p6), [#allocation2], 4294967280 }
 0x1ee   : > { %1415 = dma.done.wait (%p2258_p7), [#allocation2], 16 }
 0x1ef   : > { %1417 = vsyncadd (%p2258_p7), [#allocation2], 4294967280  ;;  %p2259_p8 = scmp.ne.s32.totalorder %s2232_s29, 0 }
 0x1f1   : > { %1419 = dma.done.wait (%p2259_p8), [#allocation2], 16 }
 0x1f2   : > { %1421 = vsyncadd (%p2259_p8), [#allocation2], 4294967280  ;;  %p2260_p10 = scmp.ne.s32.totalorder %s2234_s9, 0 }
 0x1f4   : > { %1423 = dma.done.wait (%p2260_p10), [#allocation2], 16 }
 0x1f5   : > { %1425 = vsyncadd (%p2260_p10), [#allocation2], 4294967280  ;;  %p2261_p12 = scmp.ne.s32.totalorder %s2235_s1, 0 }
 0x1f7   : > { %1427 = dma.done.wait (%p2261_p12), [#allocation2], 16 }
 0x1f8   : > { %1429 = vsyncadd (%p2261_p12), [#allocation2], 4294967280  ;;  %p2262_p5 = scmp.ne.s32.totalorder %s2236_s22, 0 }
 0x1fa   : > { %1431 = dma.done.wait (%p2262_p5), [#allocation2], 16 }
 0x1fb   : > { %1433 = vsyncadd (%p2262_p5), [#allocation2], 4294967280  ;;  %p2263_p13 = scmp.ne.s32.totalorder %s2237_s8, 0 }
 0x1fd   : > { %1435 = dma.done.wait (%p2263_p13), [#allocation2], 16 }
 0x1fe   : > { %1437 = vsyncadd (%p2263_p13), [#allocation2], 4294967280  ;;  %p2264_p2 = scmp.ne.s32.totalorder %s2240_s5, 0 }
 0x200   : > { %1439 = dma.done.wait (%p2264_p2), [#allocation2], 16 }
 0x201   : > { %1441 = vsyncadd (%p2264_p2), [#allocation2], 4294967280  ;;  %s2265_s27 = sld [smem:[#allocation77_spill]]  ;;  %v542_v0 = vld [vmem:[%s1563_s11] sm:$0xff] }
 0x202   : > { %s2266_s12 = sld [smem:[#allocation78_spill]] }
 0x207   : > { %v543_v1 = vld [vmem:[%s2265_s27] sm:$0xff] }
 0x208   : > { %v544_v2 = vadd.f32 %v543_v1, %v542_v0  ;;  %p2267_p3 = scmp.ne.s32.totalorder %s2266_s12, 0 }
 0x20a   : > { %545 = vst [vmem:[%s1563_s11] sm:$0xff] %v544_v2 }
 0x20b   : > { %1443 = dma.done.wait (%p2267_p3), [#allocation2 + $0x1], 16 }
 0x20c   : > { %1445 = vsyncadd (%p2267_p3), [#allocation2 + $0x1], 4294967280  ;;  %s2268_s29 = sld [smem:[#allocation79_spill]] }
 0x212   : > { %p2269_p11 = scmp.ne.s32.totalorder %s2268_s29, 0 }
 0x214   : > { %1447 = dma.done.wait (%p2269_p11), [#allocation2 + $0x1], 16 }
 0x215   : > { %1449 = vsyncadd (%p2269_p11), [#allocation2 + $0x1], 4294967280  ;;  %s2270_s14 = sld [smem:[#allocation80_spill]] }
 0x21b   : > { %p2271_p1 = scmp.ne.s32.totalorder %s2270_s14, 0 }
 0x21d   : > { %1451 = dma.done.wait (%p2271_p1), [#allocation2 + $0x1], 16 }
 0x21e   : > { %1453 = vsyncadd (%p2271_p1), [#allocation2 + $0x1], 4294967280  ;;  %p2272_p4 = scmp.ne.s32.totalorder %s2249_s21, 0 }
 0x220   : > { %1455 = dma.done.wait (%p2272_p4), [#allocation2 + $0x1], 16 }
 0x221   : > { %1457 = vsyncadd (%p2272_p4), [#allocation2 + $0x1], 4294967280  ;;  %p2273_p6 = scmp.ne.s32.totalorder %s2250_s19, 0 }
 0x223   : > { %1459 = dma.done.wait (%p2273_p6), [#allocation2 + $0x1], 16 }
 0x224   : > { %1461 = vsyncadd (%p2273_p6), [#allocation2 + $0x1], 4294967280  ;;  %s2274_s28 = sld [smem:[#allocation81_spill]] }
 0x22a   : > { %p2275_p7 = scmp.ne.s32.totalorder %s2274_s28, 0 }
 0x22c   : > { %1463 = dma.done.wait (%p2275_p7), [#allocation2 + $0x1], 16 }
 0x22d   : > { %1465 = vsyncadd (%p2275_p7), [#allocation2 + $0x1], 4294967280 }
 0x22e   : > { %1467 = dma.done.wait (%p2002_p0), [#allocation2 + $0x1], 16 }
 0x22f   : > { %1469 = vsyncadd (%p2002_p0), [#allocation2 + $0x1], 4294967280 }
 0x230   : > { %1471 = dma.done.wait (%p2050_p9), [#allocation2 + $0x1], 16 }
 0x231   : > { %1473 = vsyncadd (%p2050_p9), [#allocation2 + $0x1], 4294967280  ;;  %v602_v3 = vld [vmem:[%s1563_s11 + $0x8] sm:$0xff] }
 0x232   : > { %v603_v4 = vld [vmem:[%s2265_s27 + $0x8] sm:$0xff] }
 0x233   : > { %v604_v5 = vadd.f32 %v603_v4, %v602_v3 }
 0x235   : > { %605 = vst [vmem:[%s1563_s11 + $0x8] sm:$0xff] %v604_v5 }
 0x236 PF: > { %s2276_s4 = sld [smem:[#allocation74_spill]] }
 0x237   : > { %s2277_s17 = sld [smem:[#allocation72_spill]] }
 0x238   : > { %s2278_s18 = sld [smem:[#allocation73_spill]] }
 0x239   : > { %s2279_s19 = sld [smem:[#allocation75_spill]] }
 0x23a   : > { %s2280_s0 = sld [smem:[#allocation76_spill]] }
 0x23c   : > { %s19_s20 = sadd.s32 1, %s2276_s4  }
 0x23d   : > { %p16_p8 = scmp.ge.s32.totalorder %s19_s20, 6  }
 0x23f   :  { %18 = sbr.rel (!%p16_p8) target bundleno = 19 (0x13), region = 294 }
 0x244   :  { %634 = vsyncmov [#allocation2] }
 0x247   :  { %s635_s11 = vpop.sfrf %634 }
 0x248   :  { %p789_p0 = scmp.ne.s32.totalorder %s635_s11, 0 }
 0x24a   :  { %639 = shalt.err (%p789_p0)  }
 0x24b   :  { %641 = vsyncmov [#allocation2 + $0x1] }
 0x24e   :  { %s642_s9 = vpop.sfrf %641 }
 0x24f   :  { %p790_p9 = scmp.ne.s32.totalorder %s642_s9, 0 }
 0x251   :  { %646 = shalt.err (%p790_p9)  }

</bundles_post_ra>
